<compile_context>
chip_gen: v7x
topology: tpu7x:2x2x1
jax: 0.10.0
libtpu: 0.0.40
codegen_flags: <defaults>
</compile_context>

<pallas_src>
import functools

import jax
import jax.numpy as jnp
from jax import lax
from jax.experimental import pallas as pl
from jax.experimental.pallas import tpu as pltpu

TOKEN_SELF_ATTN_VALUE = -5e4     # same constant as the reference LSH attention
MASK_VALUE = -1e30

_ROW_TILE = 256                  # fixed row tile for the three row kernels


def _vmem_limit_bytes():
    """Generation-aware scoped-VMEM limit (75% of physical, 64 MiB fallback)."""
    cap = 64 * 1024 * 1024
    try:
        info = pltpu.get_tpu_info()
        cap = int(getattr(info, "vmem_capacity_bytes", cap))
    except Exception:
        pass
    return int(cap * 3 // 4)


def _pad_rows(x2d, tm=_ROW_TILE):
    """Pad rows to a multiple of tm (zero rows are harmless for LN/FFN) and
    return (padded, tile, original_rows)."""
    m = x2d.shape[0]
    if m <= tm:
        return x2d, m, m                       # single full block
    pad = (-m) % tm
    if pad:
        x2d = jnp.pad(x2d, ((0, pad), (0, 0)))
    return x2d, tm, m


def _ff_tile(dff, cap=1024):
    """Dff slab width: multiple of 128 dividing Dff (or full Dff)."""
    if dff <= cap:
        return dff
    for t in range(cap - cap % 128, 127, -128):
        if dff % t == 0:
            return t
    return dff


def _chunk_tile(c, w, dh, vmem_budget):
    """Largest chunk tile (multiple of 8 or full C) fitting the VMEM budget."""
    per_chunk = (4 * w * dh * 2 * 2          # bf16 qk/v inputs, double-buffered
                 + 8 * w * dh * 2            # shifted prev + normalized keys
                 + 4 * w * (2 * w) * 4       # dots/exp/p/mask f32 temporaries
                 + w * dh * 4 * 2)           # f32 bo output, double-buffered
    cap = max(1, vmem_budget // max(per_chunk, 1))
    if c <= cap:
        return c
    hi = min(cap, c)
    for t in range(hi - hi % 8, 7, -8):
        if c % t == 0:
            return t
    if c % 8 == 0:
        return 8
    return c


# ----------------------------- Pallas kernels ------------------------------

def _ln_qkv_kernel(x_ref, g_ref, b_ref, w_ref, o_ref):
    """Fused LayerNorm + merged shared-QK / V projection (single (D,2D) dot)."""
    x = x_ref[...]
    mean = jnp.mean(x, axis=-1, keepdims=True)
    xc = x - mean
    var = jnp.mean(xc * xc, axis=-1, keepdims=True)
    inv = lax.rsqrt(var + 1e-5)
    q = (xc * inv * g_ref[...] + b_ref[...]).astype(jnp.bfloat16)
    o_ref[...] = jnp.dot(q, w_ref[...], preferred_element_type=jnp.float32)


def fused_ln_qkv(x2d, gamma, beta, w_qk, w_v):
    M0, D = x2d.shape
    w = jnp.concatenate([w_qk, w_v], axis=1).astype(jnp.bfloat16)   # (D, 2D)
    x2d, tm, M0 = _pad_rows(x2d)
    Mp = x2d.shape[0]
    out = pl.pallas_call(
        _ln_qkv_kernel,
        grid=(Mp // tm,),
        in_specs=[
            pl.BlockSpec((tm, D), lambda i: (i, 0)),
            pl.BlockSpec((1, D), lambda i: (0, 0)),
            pl.BlockSpec((1, D), lambda i: (0, 0)),
            pl.BlockSpec((D, 2 * D), lambda i: (0, 0)),   # merged weight resident
        ],
        out_specs=pl.BlockSpec((tm, 2 * D), lambda i: (i, 0)),
        out_shape=jax.ShapeDtypeStruct((Mp, 2 * D), jnp.float32),
        compiler_params=pltpu.CompilerParams(
            dimension_semantics=("parallel",),
            vmem_limit_bytes=_vmem_limit_bytes()),
    )(x2d, gamma.reshape(1, D), beta.reshape(1, D), w)
    return out[:M0, :D], out[:M0, D:]


def _out_residual_kernel(a_ref, w_ref, b_ref, r_ref, o_ref):
    """to_out projection (+bias) + residual add (a already bf16)."""
    o_ref[...] = (jnp.dot(a_ref[...], w_ref[...],
                          preferred_element_type=jnp.float32)
                  + b_ref[...] + r_ref[...])


def fused_out_residual(a2d, w, b, resid):
    M0, D = a2d.shape
    N = w.shape[1]
    a2d, tm, M0 = _pad_rows(a2d.astype(jnp.bfloat16))   # halve attn-out DMA
    resid, _, _ = _pad_rows(resid)
    Mp = a2d.shape[0]
    out = pl.pallas_call(
        _out_residual_kernel,
        grid=(Mp // tm,),
        in_specs=[
            pl.BlockSpec((tm, D), lambda i: (i, 0)),
            pl.BlockSpec((D, N), lambda i: (0, 0)),
            pl.BlockSpec((1, N), lambda i: (0, 0)),
            pl.BlockSpec((tm, N), lambda i: (i, 0)),
        ],
        out_specs=pl.BlockSpec((tm, N), lambda i: (i, 0)),
        out_shape=jax.ShapeDtypeStruct((Mp, N), jnp.float32),
        compiler_params=pltpu.CompilerParams(
            dimension_semantics=("parallel",),
            vmem_limit_bytes=_vmem_limit_bytes()),
    )(a2d, w.astype(jnp.bfloat16), b.reshape(1, N), resid)
    return out[:M0]


def _ln_ffn_residual_kernel(x_ref, g_ref, b_ref, w1_ref, b1_ref,
                            w2_ref, b2_ref, o_ref, y_ref, acc_ref):
    """Fused LayerNorm + FFN (ReLU) + residual, Dff slab-tiled (axis 1)."""
    j = pl.program_id(1)

    @pl.when(j == 0)
    def _():
        x = x_ref[...]
        mean = jnp.mean(x, axis=-1, keepdims=True)
        xc = x - mean
        var = jnp.mean(xc * xc, axis=-1, keepdims=True)
        inv = lax.rsqrt(var + 1e-5)
        y_ref[...] = (xc * inv * g_ref[...] + b_ref[...]).astype(jnp.bfloat16)
        acc_ref[...] = jnp.zeros_like(acc_ref)

    h = (jnp.dot(y_ref[...], w1_ref[...], preferred_element_type=jnp.float32)
         + b1_ref[...])
    h = jnp.maximum(h, 0.0).astype(jnp.bfloat16)
    acc_ref[...] += jnp.dot(h, w2_ref[...], preferred_element_type=jnp.float32)

    @pl.when(j == pl.num_programs(1) - 1)
    def _():
        o_ref[...] = acc_ref[...] + b2_ref[...] + x_ref[...]


def fused_ln_ffn_residual(x2d, gamma, beta, w1, b1, w2, b2):
    M0, D = x2d.shape
    Dff = w1.shape[1]
    x2d, tm, M0 = _pad_rows(x2d)
    Mp = x2d.shape[0]
    tf = _ff_tile(Dff)
    nf = Dff // tf
    out = pl.pallas_call(
        _ln_ffn_residual_kernel,
        grid=(Mp // tm, nf),
        in_specs=[
            pl.BlockSpec((tm, D), lambda i, j: (i, 0)),
            pl.BlockSpec((1, D), lambda i, j: (0, 0)),
            pl.BlockSpec((1, D), lambda i, j: (0, 0)),
            pl.BlockSpec((D, tf), lambda i, j: (0, j)),   # w1 slab
            pl.BlockSpec((1, tf), lambda i, j: (0, j)),
            pl.BlockSpec((tf, D), lambda i, j: (j, 0)),   # w2 slab
            pl.BlockSpec((1, D), lambda i, j: (0, 0)),
        ],
        out_specs=pl.BlockSpec((tm, D), lambda i, j: (i, 0)),
        out_shape=jax.ShapeDtypeStruct((Mp, D), jnp.float32),
        scratch_shapes=[pltpu.VMEM((tm, D), jnp.bfloat16),
                        pltpu.VMEM((tm, D), jnp.float32)],
        compiler_params=pltpu.CompilerParams(
            dimension_semantics=("parallel", "arbitrary"),
            vmem_limit_bytes=_vmem_limit_bytes()),
    )(x2d, gamma.reshape(1, D), beta.reshape(1, D),
      w1.astype(jnp.bfloat16), b1.reshape(1, Dff),
      w2.astype(jnp.bfloat16), b2.reshape(1, D))
    return out[:M0]


def _lsh_chunk_attn_kernel(bqk_ref, bv_ref, hqk_ref, hv_ref, bqt_ref,
                           bkvt_ref, mq_ref, mkv_ref, bo_ref, lse_ref,
                           *, scale, wq, dh):
    bqk = bqk_ref[0]                 # (Cc, W, Dh) bf16, sorted shared-QK
    bv = bv_ref[0]                   # (Cc, W, Dh) bf16
    hqk = hqk_ref[0, 0]              # (W, Dh) bf16 halo (previous chunk)
    hv = hv_ref[0, 0]
    cc = bqk.shape[0]
    # look_one_back built in VMEM (never materialized in HBM)
    pqk = jnp.concatenate([hqk[None], bqk[:cc - 1]], axis=0)
    pv = jnp.concatenate([hv[None], bv[:cc - 1]], axis=0)

    def norm_k(z):                   # torch F.normalize, scale folded in
        zf = z.astype(jnp.float32)
        n = jnp.maximum(jnp.sqrt(jnp.sum(zf * zf, axis=-1, keepdims=True)),
                        1e-12)
        return (zf * (scale / n)).astype(jnp.bfloat16)

    k = jnp.concatenate([norm_k(bqk), norm_k(pqk)], axis=1)     # (Cc, 2W, Dh)
    vv = jnp.concatenate([bv, pv], axis=1)                      # (Cc, 2W, Dh)
    dots = jnp.einsum('cie,cje->cij', bqk, k,
                      preferred_element_type=jnp.float32)       # (Cc, W, 2W)
    # pad mask (bool combine) then shared-QK self-attention penalty
    keep = jnp.logical_and(mq_ref[0][:, :, None] > 0.5,
                           mkv_ref[0][:, None, :] > 0.5)
    dots = jnp.where(keep, dots, MASK_VALUE)
    self_mask = bqt_ref[0][:, :, None] == bkvt_ref[0][:, None, :]
    dots = jnp.where(self_mask, TOKEN_SELF_ATTN_VALUE, dots)
    # softmax in f32; divide on the EUP slot
    m = jnp.max(dots, axis=-1, keepdims=True)
    e = jnp.exp(dots - m)
    s = jnp.sum(e, axis=-1, keepdims=True)
    lse = m[..., 0] + jnp.log(s[..., 0])                        # (Cc, W)
    p = e * pl.reciprocal(s, approx=True)
    out = jnp.einsum('cij,cje->cie', p.astype(jnp.bfloat16), vv,
                     preferred_element_type=jnp.float32)        # (Cc, W, Dh)
    # lane-dense store of the attention output (W*Dh lanes instead of Dh)
    bo_ref[0] = out.reshape(cc, wq * dh)
    lse_ref[0] = lse


def lsh_chunk_attention(bqk, bv, bq_t, bkv_t, mq, mkv, scale):
    BH, C, W, Dh = bqk.shape
    Cc = _chunk_tile(C, W, Dh, _vmem_limit_bytes() // 2)
    kernel = functools.partial(_lsh_chunk_attn_kernel, scale=scale, wq=W, dh=Dh)

    def cur4(b, c):
        return (b, c, 0, 0)

    def halo4(b, c):                 # previous chunk of the first chunk in tile
        return (b, (c * Cc + C - 1) % C, 0, 0)

    return pl.pallas_call(
        kernel,
        grid=(BH, C // Cc),
        in_specs=[
            pl.BlockSpec((1, Cc, W, Dh), cur4),            # qk current chunks
            pl.BlockSpec((1, Cc, W, Dh), cur4),            # v  current chunks
            pl.BlockSpec((1, 1, W, Dh), halo4),            # qk halo chunk
            pl.BlockSpec((1, 1, W, Dh), halo4),            # v  halo chunk
            pl.BlockSpec((1, Cc, W), lambda b, c: (b, c, 0)),        # q ids
            pl.BlockSpec((1, Cc, 2 * W), lambda b, c: (b, c, 0)),    # kv ids
            pl.BlockSpec((1, Cc, W), lambda b, c: (b, c, 0)),        # q mask
            pl.BlockSpec((1, Cc, 2 * W), lambda b, c: (b, c, 0)),    # kv mask
        ],
        out_specs=(
            pl.BlockSpec((1, Cc, W * Dh), lambda b, c: (b, c, 0)),
            pl.BlockSpec((1, Cc, W), lambda b, c: (b, c, 0)),
        ),
        out_shape=(
            jax.ShapeDtypeStruct((BH, C, W * Dh), jnp.float32),
            jax.ShapeDtypeStruct((BH, C, W), jnp.float32),
        ),
        compiler_params=pltpu.CompilerParams(
            dimension_semantics=("parallel", "parallel"),
            vmem_limit_bytes=_vmem_limit_bytes()),
    )(bqk, bv, bqk, bv, bq_t, bkv_t, mq, mkv)


# ------------------------------ LSH attention -------------------------------

def lsh_attention(qk, v, keep, *, bucket_size, n_hashes, rot_key):
    """Shared-QK LSH attention over a head-merged batch (BH, T, Dh)."""
    BH, T, Dh = qk.shape
    n_buckets = T // bucket_size
    scale = Dh ** -0.5
    # int32 sort-key overflow guard (review correctness concern)
    assert T * n_hashes * n_buckets < 2 ** 31, "sort key overflows int32"

    # ---- hashing (glue, f32) ----
    rotations = jax.random.normal(rot_key, (Dh, n_hashes, n_buckets // 2),
                                  dtype=jnp.float32)
    rotated = jnp.einsum('btf,fhi->bhti', qk, rotations)
    rotated = jnp.concatenate([rotated, -rotated], axis=-1)
    buckets = jnp.argmax(rotated, axis=-1)                     # (BH, nh, T)
    offsets = jnp.arange(n_hashes, dtype=buckets.dtype) * n_buckets
    buckets = (buckets + offsets[None, :, None]).reshape(BH, n_hashes * T)

    # ---- sort tokens by (bucket, position), gather (glue) ----
    ticker = jnp.arange(n_hashes * T, dtype=jnp.int32)[None, :]
    buckets_and_t = T * buckets + (ticker % T)
    sticker = jnp.argsort(buckets_and_t, axis=-1).astype(jnp.int32)
    undo_sort = jnp.argsort(sticker, axis=-1).astype(jnp.int32)
    st = (sticker % T).astype(jnp.int32)

    # gather in bf16 so the chunk kernel DMAs half the bytes
    sqk = jnp.take_along_axis(qk.astype(jnp.bfloat16), st[..., None], axis=1)
    sv = jnp.take_along_axis(v.astype(jnp.bfloat16), st[..., None], axis=1)
    smask = jnp.take_along_axis(keep, st, axis=1)

    C = n_hashes * n_buckets
    W = bucket_size
    bq_t = st.reshape(BH, C, W)
    bqk = sqk.reshape(BH, C, W, Dh)
    bv = sv.reshape(BH, C, W, Dh)
    bmq = smask.reshape(BH, C, W)

    # only the tiny id / mask tensors get an HBM look-one-back copy; the big
    # k/v look-back is halo-fetched inside the kernel.
    def look_one_back_small(z):
        return jnp.concatenate([z, jnp.roll(z, 1, axis=1)], axis=-1)

    bkv_t = look_one_back_small(bq_t)        # (BH, C, 2W) int32
    bmkv = look_one_back_small(bmq)          # (BH, C, 2W) f32

    # ---- per-chunk attention hot path (Pallas) ----
    bo, lse = lsh_chunk_attention(bqk, bv, bq_t, bkv_t, bmq, bmkv, scale)

    # ---- unsort + combine hash rounds (glue) ----
    so = bo.reshape(BH, n_hashes * T, Dh)
    slogits = lse.reshape(BH, n_hashes * T)
    o = jnp.take_along_axis(so, undo_sort[..., None], axis=1)
    logits = jnp.take_along_axis(slogits, undo_sort, axis=1)
    o = o.reshape(BH, n_hashes, T, Dh)
    logits = logits.reshape(BH, n_hashes, T, 1)
    probs = jnp.exp(logits - jax.scipy.special.logsumexp(logits, axis=1,
                                                         keepdims=True))
    return jnp.sum(o * probs, axis=1)                          # (BH, T, Dh)


# ----------------------------- Encoder layer --------------------------------

def reformer_encoder_layer(x, pad_mask, params, *, heads, bucket_size,
                           n_hashes, rot_key):
    """x: (B, T, D) float32; pad_mask: (B, T) bool, True = padding."""
    B, T, D = x.shape
    Dh = D // heads
    x2d = x.reshape(B * T, D)

    # preprocess_attn + merged shared-QK / V projection (no projection bias)
    qk2d, v2d = fused_ln_qkv(x2d, params['ln1_g'], params['ln1_b'],
                             params['w_qk'], params['w_v'])
    qk = qk2d.reshape(B, T, D)
    v = v2d.reshape(B, T, D)

    def split_heads(z):
        return z.reshape(B, T, heads, Dh).transpose(0, 2, 1, 3).reshape(
            B * heads, T, Dh)

    qk_h = split_heads(qk)
    v_h = split_heads(v)
    keep = 1.0 - pad_mask.astype(jnp.float32)                  # 1 = keep
    keep_h = jnp.broadcast_to(keep[:, None, :], (B, heads, T)).reshape(
        B * heads, T)

    attn_h = lsh_attention(qk_h, v_h, keep_h, bucket_size=bucket_size,
                           n_hashes=n_hashes, rot_key=rot_key)
    attn2d = attn_h.reshape(B, heads, T, Dh).transpose(0, 2, 1, 3).reshape(
        B * T, D)

    # postprocess_attn: to_out projection (+bias) + residual (dropout = id)
    h2d = fused_out_residual(attn2d, params['w_out'], params['b_out'], x2d)

    # preprocess_ffn + FFN + postprocess_ffn residual, fused (dropout = id)
    out2d = fused_ln_ffn_residual(h2d, params['ln2_g'], params['ln2_b'],
                                  params['w_ff1'], params['b_ff1'],
                                  params['w_ff2'], params['b_ff2'])
    return out2d.reshape(B, T, D)


def init_params(key, d_model, inner):
    ks = jax.random.split(key, 5)
    s = 0.05
    return dict(
        ln1_g=jnp.ones((d_model,), jnp.float32),
        ln1_b=jnp.zeros((d_model,), jnp.float32),
        ln2_g=jnp.ones((d_model,), jnp.float32),
        ln2_b=jnp.zeros((d_model,), jnp.float32),
        # weights stored (in, out) == torch weight.T
        w_qk=jax.random.normal(ks[0], (d_model, d_model), jnp.float32) * s,
        w_v=jax.random.normal(ks[1], (d_model, d_model), jnp.float32) * s,
        w_out=jax.random.normal(ks[2], (d_model, d_model), jnp.float32) * s,
        b_out=jnp.zeros((d_model,), jnp.float32),
        w_ff1=jax.random.normal(ks[3], (d_model, inner), jnp.float32) * s,
        b_ff1=jnp.zeros((inner,), jnp.float32),
        w_ff2=jax.random.normal(ks[4], (inner, d_model), jnp.float32) * s,
        b_ff2=jnp.zeros((d_model,), jnp.float32),
    )


if __name__ == "__main__":
    # small shapes consistent with the module:
    # model_size=32, inner_size=64, heads=4, bucket_size=4, n_hashes=2
    B, T, D = 2, 16, 32
    INNER, HEADS, BUCKET, NHASH = 64, 4, 4, 2

    key = jax.random.PRNGKey(0)
    kx, kp, kr = jax.random.split(key, 3)
    x = jax.random.normal(kx, (B, T, D), jnp.float32)
    pad_mask = jnp.zeros((B, T), jnp.bool_)        # no padding
    params = init_params(kp, D, INNER)

    fwd = jax.jit(functools.partial(reformer_encoder_layer, heads=HEADS,
                                    bucket_size=BUCKET, n_hashes=NHASH,
                                    rot_key=kr))
    out = fwd(x, pad_mask, params)
    out = jax.block_until_ready(out)
    assert out.shape == (B, T, D)
    assert bool(jnp.all(jnp.isfinite(out)))
    print("KERNEL_OK")
</pallas_src>

<mosaic_0001>
module attributes {stable_mosaic.version = 11 : i64} {
  func.func @_ln_qkv_kernel(%arg0: i32, %arg1: memref<32x32xf32, #tpu.memory_space<vmem>>, %arg2: memref<1x32xf32, #tpu.memory_space<vmem>>, %arg3: memref<1x32xf32, #tpu.memory_space<vmem>>, %arg4: memref<32x64xbf16, #tpu.memory_space<vmem>>, %arg5: memref<32x64xf32, #tpu.memory_space<vmem>>) attributes {dimension_semantics = [#tpu.dimension_semantics<parallel>], iteration_bounds = array<i64: 1>, scalar_prefetch = 0 : i64, scratch_operands = 0 : i64, tpu.core_type = #tpu.core_type<tc>, window_params = [{transform_indices = @transform_0, window_bounds = array<i64: 32, 32>}, {pipeline_mode = #tpu.pipeline_mode<synchronous>, transform_indices = @transform_1, window_bounds = array<i64: 1, 32>}, {pipeline_mode = #tpu.pipeline_mode<synchronous>, transform_indices = @transform_2, window_bounds = array<i64: 1, 32>}, {pipeline_mode = #tpu.pipeline_mode<synchronous>, transform_indices = @transform_3, window_bounds = array<i64: 32, 64>}, {transform_indices = @transform_4, window_bounds = array<i64: 32, 64>}]} {
    %c0 = arith.constant 0 : index
    %c0_0 = arith.constant 0 : index
    %0 = vector.load %arg1[%c0, %c0_0] : memref<32x32xf32, #tpu.memory_space<vmem>>, vector<32x32xf32>
    %cst = arith.constant dense<0.000000e+00> : vector<32xf32>
    %1 = vector.multi_reduction <add>, %0, %cst [1] : vector<32x32xf32> to vector<32xf32>
    %2 = vector.shape_cast %1 : vector<32xf32> to vector<32x1xf32>
    %cst_1 = arith.constant 3.200000e+01 : f32
    %3 = vector.broadcast %cst_1 : f32 to vector<32x1xf32>
    %4 = arith.divf %2, %3 : vector<32x1xf32>
    %5 = vector.broadcast %4 : vector<32x1xf32> to vector<32x32xf32>
    %6 = arith.subf %0, %5 : vector<32x32xf32>
    %7 = arith.mulf %6, %6 : vector<32x32xf32>
    %cst_2 = arith.constant dense<0.000000e+00> : vector<32xf32>
    %8 = vector.multi_reduction <add>, %7, %cst_2 [1] : vector<32x32xf32> to vector<32xf32>
    %9 = vector.shape_cast %8 : vector<32xf32> to vector<32x1xf32>
    %cst_3 = arith.constant 3.200000e+01 : f32
    %10 = vector.broadcast %cst_3 : f32 to vector<32x1xf32>
    %11 = arith.divf %9, %10 : vector<32x1xf32>
    %cst_4 = arith.constant 9.99999974E-6 : f32
    %12 = vector.broadcast %cst_4 : f32 to vector<32x1xf32>
    %13 = arith.addf %11, %12 : vector<32x1xf32>
    %14 = math.rsqrt %13 : vector<32x1xf32>
    %15 = vector.broadcast %14 : vector<32x1xf32> to vector<32x32xf32>
    %16 = arith.mulf %6, %15 : vector<32x32xf32>
    %c0_5 = arith.constant 0 : index
    %c0_6 = arith.constant 0 : index
    %17 = vector.load %arg2[%c0_5, %c0_6] : memref<1x32xf32, #tpu.memory_space<vmem>>, vector<1x32xf32>
    %18 = vector.broadcast %17 : vector<1x32xf32> to vector<32x32xf32>
    %19 = arith.mulf %16, %18 : vector<32x32xf32>
    %c0_7 = arith.constant 0 : index
    %c0_8 = arith.constant 0 : index
    %20 = vector.load %arg3[%c0_7, %c0_8] : memref<1x32xf32, #tpu.memory_space<vmem>>, vector<1x32xf32>
    %21 = vector.broadcast %20 : vector<1x32xf32> to vector<32x32xf32>
    %22 = arith.addf %19, %21 : vector<32x32xf32>
    %23 = arith.truncf %22 : vector<32x32xf32> to vector<32x32xbf16>
    %c0_9 = arith.constant 0 : index
    %c0_10 = arith.constant 0 : index
    %24 = vector.load %arg4[%c0_9, %c0_10] : memref<32x64xbf16, #tpu.memory_space<vmem>>, vector<32x64xbf16>
    %cst_11 = arith.constant dense<0.000000e+00> : vector<32x64xf32>
    %25 = tpu.matmul %23, %24, %cst_11 {dimension_numbers = #tpu.dot_dimension_numbers<[1], [0], [0], [1], [0, 0, 1, 1], [], []>} : vector<32x32xbf16>, vector<32x64xbf16>, vector<32x64xf32> -> vector<32x64xf32>
    %c0_12 = arith.constant 0 : index
    %c0_13 = arith.constant 0 : index
    %26 = vector.load %arg5[%c0_12, %c0_13] : memref<32x64xf32, #tpu.memory_space<vmem>>, vector<32x64xf32>
    tpu.vector_store %arg5[%c0_12, %c0_13], %25 {strides = array<i32>} : memref<32x64xf32, #tpu.memory_space<vmem>>, vector<32x64xf32>,
    return
  }
  func.func @transform_0(%arg0: i32) -> (i32, i32) {
    %c0_i32 = arith.constant 0 : i32
    %c0_i32_0 = arith.constant 0 : i32
    return %arg0, %c0_i32 : i32, i32
  }
  func.func @transform_1(%arg0: i32) -> (i32, i32) {
    %c0_i32 = arith.constant 0 : i32
    %c0_i32_0 = arith.constant 0 : i32
    %c0_i32_1 = arith.constant 0 : i32
    return %c0_i32, %c0_i32_0 : i32, i32
  }
  func.func @transform_2(%arg0: i32) -> (i32, i32) {
    %c0_i32 = arith.constant 0 : i32
    %c0_i32_0 = arith.constant 0 : i32
    %c0_i32_1 = arith.constant 0 : i32
    return %c0_i32, %c0_i32_0 : i32, i32
  }
  func.func @transform_3(%arg0: i32) -> (i32, i32) {
    %c0_i32 = arith.constant 0 : i32
    %c0_i32_0 = arith.constant 0 : i32
    %c0_i32_1 = arith.constant 0 : i32
    return %c0_i32, %c0_i32_0 : i32, i32
  }
  func.func @transform_4(%arg0: i32) -> (i32, i32) {
    %c0_i32 = arith.constant 0 : i32
    %c0_i32_0 = arith.constant 0 : i32
    return %arg0, %c0_i32 : i32, i32
  }
}

module attributes {stable_mosaic.version = 11 : i64} {
  func.func @_lsh_chunk_attn_kernel(%arg0: i32, %arg1: i32, %arg2: memref<1x8x4x8xbf16, #tpu.memory_space<vmem>>, %arg3: memref<1x8x4x8xbf16, #tpu.memory_space<vmem>>, %arg4: memref<1x1x4x8xbf16, #tpu.memory_space<vmem>>, %arg5: memref<1x1x4x8xbf16, #tpu.memory_space<vmem>>, %arg6: memref<1x8x4xi32, #tpu.memory_space<vmem>>, %arg7: memref<1x8x8xi32, #tpu.memory_space<vmem>>, %arg8: memref<1x8x4xf32, #tpu.memory_space<vmem>>, %arg9: memref<1x8x8xf32, #tpu.memory_space<vmem>>, %arg10: memref<1x8x32xf32, #tpu.memory_space<vmem>>, %arg11: memref<1x8x4xf32, #tpu.memory_space<vmem>>) attributes {dimension_semantics = [#tpu.dimension_semantics<parallel>, #tpu.dimension_semantics<parallel>], iteration_bounds = array<i64: 8, 1>, scalar_prefetch = 0 : i64, scratch_operands = 0 : i64, tpu.core_type = #tpu.core_type<tc>, window_params = [{transform_indices = @transform_0, window_bounds = array<i64: 1, 8, 4, 8>}, {transform_indices = @transform_1, window_bounds = array<i64: 1, 8, 4, 8>}, {transform_indices = @transform_2, window_bounds = array<i64: 1, 1, 4, 8>}, {transform_indices = @transform_3, window_bounds = array<i64: 1, 1, 4, 8>}, {transform_indices = @transform_4, window_bounds = array<i64: 1, 8, 4>}, {transform_indices = @transform_5, window_bounds = array<i64: 1, 8, 8>}, {transform_indices = @transform_6, window_bounds = array<i64: 1, 8, 4>}, {transform_indices = @transform_7, window_bounds = array<i64: 1, 8, 8>}, {transform_indices = @transform_8, window_bounds = array<i64: 1, 8, 32>}, {transform_indices = @transform_9, window_bounds = array<i64: 1, 8, 4>}]} {
    %c0 = arith.constant 0 : index
    %c0_0 = arith.constant 0 : index
    %c0_1 = arith.constant 0 : index
    %c0_2 = arith.constant 0 : index
    %0 = vector.load %arg2[%c0, %c0_0, %c0_1, %c0_2] : memref<1x8x4x8xbf16, #tpu.memory_space<vmem>>, vector<1x8x4x8xbf16>
    %1 = vector.shape_cast %0 : vector<1x8x4x8xbf16> to vector<8x4x8xbf16>
    %c0_3 = arith.constant 0 : index
    %c0_4 = arith.constant 0 : index
    %c0_5 = arith.constant 0 : index
    %c0_6 = arith.constant 0 : index
    %2 = vector.load %arg3[%c0_3, %c0_4, %c0_5, %c0_6] : memref<1x8x4x8xbf16, #tpu.memory_space<vmem>>, vector<1x8x4x8xbf16>
    %3 = vector.shape_cast %2 : vector<1x8x4x8xbf16> to vector<8x4x8xbf16>
    %c0_7 = arith.constant 0 : index
    %c0_8 = arith.constant 0 : index
    %c0_9 = arith.constant 0 : index
    %c0_10 = arith.constant 0 : index
    %4 = vector.load %arg4[%c0_7, %c0_8, %c0_9, %c0_10] : memref<1x1x4x8xbf16, #tpu.memory_space<vmem>>, vector<1x1x4x8xbf16>
    %5 = vector.shape_cast %4 : vector<1x1x4x8xbf16> to vector<4x8xbf16>
    %c0_11 = arith.constant 0 : index
    %c0_12 = arith.constant 0 : index
    %c0_13 = arith.constant 0 : index
    %c0_14 = arith.constant 0 : index
    %6 = vector.load %arg5[%c0_11, %c0_12, %c0_13, %c0_14] : memref<1x1x4x8xbf16, #tpu.memory_space<vmem>>, vector<1x1x4x8xbf16>
    %7 = vector.shape_cast %6 : vector<1x1x4x8xbf16> to vector<4x8xbf16>
    %8 = vector.shape_cast %5 : vector<4x8xbf16> to vector<1x4x8xbf16>
    %9 = vector.extract_strided_slice %1 {offsets = [0, 0, 0], sizes = [7, 4, 8], strides = [1, 1, 1]} : vector<8x4x8xbf16> to vector<7x4x8xbf16>
    %10 = tpu.concatenate %8, %9 in 0 : vector<1x4x8xbf16>, vector<7x4x8xbf16> -> vector<8x4x8xbf16>
    %11 = vector.shape_cast %7 : vector<4x8xbf16> to vector<1x4x8xbf16>
    %12 = vector.extract_strided_slice %3 {offsets = [0, 0, 0], sizes = [7, 4, 8], strides = [1, 1, 1]} : vector<8x4x8xbf16> to vector<7x4x8xbf16>
    %13 = tpu.concatenate %11, %12 in 0 : vector<1x4x8xbf16>, vector<7x4x8xbf16> -> vector<8x4x8xbf16>
    %14 = arith.extf %1 : vector<8x4x8xbf16> to vector<8x4x8xf32>
    %15 = arith.mulf %14, %14 : vector<8x4x8xf32>
    %cst = arith.constant dense<0.000000e+00> : vector<8x4xf32>
    %16 = vector.multi_reduction <add>, %15, %cst [2] : vector<8x4x8xf32> to vector<8x4xf32>
    %17 = vector.shape_cast %16 : vector<8x4xf32> to vector<8x4x1xf32>
    %18 = math.sqrt %17 : vector<8x4x1xf32>
    %cst_15 = arith.constant 9.99999996E-13 : f32
    %19 = vector.broadcast %cst_15 : f32 to vector<8x4x1xf32>
    %20 = arith.maximumf %18, %19 : vector<8x4x1xf32>
    %cst_16 = arith.constant 0.353553385 : f32
    %21 = vector.broadcast %cst_16 : f32 to vector<8x4x1xf32>
    %22 = arith.divf %21, %20 : vector<8x4x1xf32>
    %23 = vector.broadcast %22 : vector<8x4x1xf32> to vector<8x4x8xf32>
    %24 = arith.mulf %14, %23 : vector<8x4x8xf32>
    %25 = arith.truncf %24 : vector<8x4x8xf32> to vector<8x4x8xbf16>
    %26 = arith.extf %10 : vector<8x4x8xbf16> to vector<8x4x8xf32>
    %27 = arith.mulf %26, %26 : vector<8x4x8xf32>
    %cst_17 = arith.constant dense<0.000000e+00> : vector<8x4xf32>
    %28 = vector.multi_reduction <add>, %27, %cst_17 [2] : vector<8x4x8xf32> to vector<8x4xf32>
    %29 = vector.shape_cast %28 : vector<8x4xf32> to vector<8x4x1xf32>
    %30 = math.sqrt %29 : vector<8x4x1xf32>
    %cst_18 = arith.constant 9.99999996E-13 : f32
    %31 = vector.broadcast %cst_18 : f32 to vector<8x4x1xf32>
    %32 = arith.maximumf %30, %31 : vector<8x4x1xf32>
    %cst_19 = arith.constant 0.353553385 : f32
    %33 = vector.broadcast %cst_19 : f32 to vector<8x4x1xf32>
    %34 = arith.divf %33, %32 : vector<8x4x1xf32>
    %35 = vector.broadcast %34 : vector<8x4x1xf32> to vector<8x4x8xf32>
    %36 = arith.mulf %26, %35 : vector<8x4x8xf32>
    %37 = arith.truncf %36 : vector<8x4x8xf32> to vector<8x4x8xbf16>
    %38 = tpu.concatenate %25, %37 in 1 : vector<8x4x8xbf16>, vector<8x4x8xbf16> -> vector<8x8x8xbf16>
    %39 = tpu.concatenate %3, %13 in 1 : vector<8x4x8xbf16>, vector<8x4x8xbf16> -> vector<8x8x8xbf16>
    "tpu.trace_start"() <{level = 10 : i32, message = "cie,cje->cij"}> : () -> ()
    %cst_20 = arith.constant dense<0.000000e+00> : vector<8x4x8xf32>
    %40 = tpu.matmul %1, %38, %cst_20 {dimension_numbers = #tpu.dot_dimension_numbers<[2], [2], [1], [1], [0, 0, 0, 1, 1, 1], [0], [0]>} : vector<8x4x8xbf16>, vector<8x8x8xbf16>, vector<8x4x8xf32> -> vector<8x4x8xf32>
    "tpu.trace_stop"() : () -> ()
    %c0_21 = arith.constant 0 : index
    %c0_22 = arith.constant 0 : index
    %c0_23 = arith.constant 0 : index
    %41 = vector.load %arg8[%c0_21, %c0_22, %c0_23] : memref<1x8x4xf32, #tpu.memory_space<vmem>>, vector<1x8x4xf32>
    %42 = vector.shape_cast %41 : vector<1x8x4xf32> to vector<8x4xf32>
    %43 = vector.shape_cast %42 : vector<8x4xf32> to vector<8x4x1xf32>
    %cst_24 = arith.constant 5.000000e-01 : f32
    %44 = vector.broadcast %cst_24 : f32 to vector<8x4x1xf32>
    %45 = arith.cmpf ogt, %43, %44 : vector<8x4x1xf32>
    %c0_25 = arith.constant 0 : index
    %c0_26 = arith.constant 0 : index
    %c0_27 = arith.constant 0 : index
    %46 = vector.load %arg9[%c0_25, %c0_26, %c0_27] : memref<1x8x8xf32, #tpu.memory_space<vmem>>, vector<1x8x8xf32>
    %47 = vector.shape_cast %46 : vector<1x8x8xf32> to vector<8x8xf32>
    %48 = vector.shape_cast %47 : vector<8x8xf32> to vector<8x1x8xf32>
    %cst_28 = arith.constant 5.000000e-01 : f32
    %49 = vector.broadcast %cst_28 : f32 to vector<8x1x8xf32>
    %50 = arith.cmpf ogt, %48, %49 : vector<8x1x8xf32>
    %51 = vector.broadcast %45 : vector<8x4x1xi1> to vector<8x4x8xi1>
    %52 = vector.broadcast %50 : vector<8x1x8xi1> to vector<8x4x8xi1>
    %53 = arith.andi %51, %52 : vector<8x4x8xi1>
    %cst_29 = arith.constant -1.000000e+30 : f32
    %54 = vector.broadcast %cst_29 : f32 to vector<8x4x8xf32>
    %55 = arith.select %53, %40, %54 : vector<8x4x8xi1>, vector<8x4x8xf32>
    %c0_30 = arith.constant 0 : index
    %c0_31 = arith.constant 0 : index
    %c0_32 = arith.constant 0 : index
    %56 = vector.load %arg6[%c0_30, %c0_31, %c0_32] : memref<1x8x4xi32, #tpu.memory_space<vmem>>, vector<1x8x4xi32>
    %57 = vector.shape_cast %56 : vector<1x8x4xi32> to vector<8x4xi32>
    %58 = vector.shape_cast %57 : vector<8x4xi32> to vector<8x4x1xi32>
    %c0_33 = arith.constant 0 : index
    %c0_34 = arith.constant 0 : index
    %c0_35 = arith.constant 0 : index
    %59 = vector.load %arg7[%c0_33, %c0_34, %c0_35] : memref<1x8x8xi32, #tpu.memory_space<vmem>>, vector<1x8x8xi32>
    %60 = vector.shape_cast %59 : vector<1x8x8xi32> to vector<8x8xi32>
    %61 = vector.shape_cast %60 : vector<8x8xi32> to vector<8x1x8xi32>
    %62 = vector.broadcast %58 : vector<8x4x1xi32> to vector<8x4x8xi32>
    %63 = vector.broadcast %61 : vector<8x1x8xi32> to vector<8x4x8xi32>
    %64 = arith.cmpi eq, %62, %63 : vector<8x4x8xi32>
    %cst_36 = arith.constant -5.000000e+04 : f32
    %65 = vector.broadcast %cst_36 : f32 to vector<8x4x8xf32>
    %66 = arith.select %64, %65, %55 : vector<8x4x8xi1>, vector<8x4x8xf32>
    %cst_37 = arith.constant dense<0xFF800000> : vector<8x4xf32>
    %67 = vector.multi_reduction <maximumf>, %66, %cst_37 [2] : vector<8x4x8xf32> to vector<8x4xf32>
    %68 = vector.shape_cast %67 : vector<8x4xf32> to vector<8x4x1xf32>
    %69 = vector.broadcast %68 : vector<8x4x1xf32> to vector<8x4x8xf32>
    %70 = arith.subf %66, %69 : vector<8x4x8xf32>
    %71 = math.exp %70 : vector<8x4x8xf32>
    %cst_38 = arith.constant dense<0.000000e+00> : vector<8x4xf32>
    %72 = vector.multi_reduction <add>, %71, %cst_38 [2] : vector<8x4x8xf32> to vector<8x4xf32>
    %73 = vector.shape_cast %72 : vector<8x4xf32> to vector<8x4x1xf32>
    %74 = vector.shape_cast %68 : vector<8x4x1xf32> to vector<8x4xf32>
    %75 = vector.shape_cast %73 : vector<8x4x1xf32> to vector<8x4xf32>
    %76 = math.log %75 : vector<8x4xf32>
    %77 = arith.addf %74, %76 : vector<8x4xf32>
    %78 = tpu.reciprocal %73 {approx = true} : vector<8x4x1xf32> -> vector<8x4x1xf32>
    %79 = vector.broadcast %78 : vector<8x4x1xf32> to vector<8x4x8xf32>
    %80 = arith.mulf %71, %79 : vector<8x4x8xf32>
    %81 = arith.truncf %80 : vector<8x4x8xf32> to vector<8x4x8xbf16>
    "tpu.trace_start"() <{level = 10 : i32, message = "cij,cje->cie"}> : () -> ()
    %cst_39 = arith.constant dense<0.000000e+00> : vector<8x4x8xf32>
    %82 = tpu.matmul %81, %39, %cst_39 {dimension_numbers = #tpu.dot_dimension_numbers<[2], [1], [1], [2], [0, 0, 0, 1, 1, 2], [0], [0]>} : vector<8x4x8xbf16>, vector<8x8x8xbf16>, vector<8x4x8xf32> -> vector<8x4x8xf32>
    "tpu.trace_stop"() : () -> ()
    %83 = vector.shape_cast %82 : vector<8x4x8xf32> to vector<8x32xf32>
    %c0_40 = arith.constant 0 : index
    %c0_41 = arith.constant 0 : index
    %c0_42 = arith.constant 0 : index
    %84 = vector.load %arg10[%c0_40, %c0_41, %c0_42] : memref<1x8x32xf32, #tpu.memory_space<vmem>>, vector<1x8x32xf32>
    %85 = vector.shape_cast %84 : vector<1x8x32xf32> to vector<8x32xf32>
    %86 = vector.shape_cast %83 : vector<8x32xf32> to vector<1x8x32xf32>
    tpu.vector_store %arg10[%c0_40, %c0_41, %c0_42], %86 {strides = array<i32>} : memref<1x8x32xf32, #tpu.memory_space<vmem>>, vector<1x8x32xf32>,
    %c0_43 = arith.constant 0 : index
    %c0_44 = arith.constant 0 : index
    %c0_45 = arith.constant 0 : index
    %87 = vector.load %arg11[%c0_43, %c0_44, %c0_45] : memref<1x8x4xf32, #tpu.memory_space<vmem>>, vector<1x8x4xf32>
    %88 = vector.shape_cast %87 : vector<1x8x4xf32> to vector<8x4xf32>
    %89 = vector.shape_cast %77 : vector<8x4xf32> to vector<1x8x4xf32>
    tpu.vector_store %arg11[%c0_43, %c0_44, %c0_45], %89 {strides = array<i32>} : memref<1x8x4xf32, #tpu.memory_space<vmem>>, vector<1x8x4xf32>,
    return
  }
  func.func @transform_0(%arg0: i32, %arg1: i32) -> (i32, i32, i32, i32) {
    %c0_i32 = arith.constant 0 : i32
    %c0_i32_0 = arith.constant 0 : i32
    %c0_i32_1 = arith.constant 0 : i32
    return %arg0, %arg1, %c0_i32, %c0_i32_0 : i32, i32, i32, i32
  }
  func.func @transform_1(%arg0: i32, %arg1: i32) -> (i32, i32, i32, i32) {
    %c0_i32 = arith.constant 0 : i32
    %c0_i32_0 = arith.constant 0 : i32
    %c0_i32_1 = arith.constant 0 : i32
    return %arg0, %arg1, %c0_i32, %c0_i32_0 : i32, i32, i32, i32
  }
  func.func @transform_2(%arg0: i32, %arg1: i32) -> (i32, i32, i32, i32) {
    %c8_i32 = arith.constant 8 : i32
    %0 = arith.muli %arg1, %c8_i32 : i32
    %c8_i32_0 = arith.constant 8 : i32
    %1 = arith.addi %0, %c8_i32_0 : i32
    %c1_i32 = arith.constant 1 : i32
    %2 = arith.subi %1, %c1_i32 : i32
    %c8_i32_1 = arith.constant 8 : i32
    %c0_i32 = arith.constant 0 : i32
    %3 = arith.cmpi eq, %c8_i32_1, %c0_i32 : i32
    %c1_i32_2 = arith.constant 1 : i32
    %4 = arith.select %3, %c1_i32_2, %c8_i32_1 : i32
    %5 = arith.remsi %2, %4 : i32
    %c0_i32_3 = arith.constant 0 : i32
    %6 = arith.cmpi ne, %5, %c0_i32_3 : i32
    %c0_i32_4 = arith.constant 0 : i32
    %7 = arith.cmpi slt, %5, %c0_i32_4 : i32
    %c0_i32_5 = arith.constant 0 : i32
    %8 = arith.cmpi slt, %4, %c0_i32_5 : i32
    %9 = arith.xori %7, %8 : i1
    %10 = arith.andi %9, %6 : i1
    %11 = arith.addi %5, %4 : i32
    %12 = arith.select %10, %11, %5 : i32
    %c0_i32_6 = arith.constant 0 : i32
    %c0_i32_7 = arith.constant 0 : i32
    %c0_i32_8 = arith.constant 0 : i32
    return %arg0, %12, %c0_i32_6, %c0_i32_7 : i32, i32, i32, i32
  }
  func.func @transform_3(%arg0: i32, %arg1: i32) -> (i32, i32, i32, i32) {
    %c8_i32 = arith.constant 8 : i32
    %0 = arith.muli %arg1, %c8_i32 : i32
    %c8_i32_0 = arith.constant 8 : i32
    %1 = arith.addi %0, %c8_i32_0 : i32
    %c1_i32 = arith.constant 1 : i32
    %2 = arith.subi %1, %c1_i32 : i32
    %c8_i32_1 = arith.constant 8 : i32
    %c0_i32 = arith.constant 0 : i32
    %3 = arith.cmpi eq, %c8_i32_1, %c0_i32 : i32
    %c1_i32_2 = arith.constant 1 : i32
    %4 = arith.select %3, %c1_i32_2, %c8_i32_1 : i32
    %5 = arith.remsi %2, %4 : i32
    %c0_i32_3 = arith.constant 0 : i32
    %6 = arith.cmpi ne, %5, %c0_i32_3 : i32
    %c0_i32_4 = arith.constant 0 : i32
    %7 = arith.cmpi slt, %5, %c0_i32_4 : i32
    %c0_i32_5 = arith.constant 0 : i32
    %8 = arith.cmpi slt, %4, %c0_i32_5 : i32
    %9 = arith.xori %7, %8 : i1
    %10 = arith.andi %9, %6 : i1
    %11 = arith.addi %5, %4 : i32
    %12 = arith.select %10, %11, %5 : i32
    %c0_i32_6 = arith.constant 0 : i32
    %c0_i32_7 = arith.constant 0 : i32
    %c0_i32_8 = arith.constant 0 : i32
    return %arg0, %12, %c0_i32_6, %c0_i32_7 : i32, i32, i32, i32
  }
  func.func @transform_4(%arg0: i32, %arg1: i32) -> (i32, i32, i32) {
    %c0_i32 = arith.constant 0 : i32
    %c0_i32_0 = arith.constant 0 : i32
    return %arg0, %arg1, %c0_i32 : i32, i32, i32
  }
  func.func @transform_5(%arg0: i32, %arg1: i32) -> (i32, i32, i32) {
    %c0_i32 = arith.constant 0 : i32
    %c0_i32_0 = arith.constant 0 : i32
    return %arg0, %arg1, %c0_i32 : i32, i32, i32
  }
  func.func @transform_6(%arg0: i32, %arg1: i32) -> (i32, i32, i32) {
    %c0_i32 = arith.constant 0 : i32
    %c0_i32_0 = arith.constant 0 : i32
    return %arg0, %arg1, %c0_i32 : i32, i32, i32
  }
  func.func @transform_7(%arg0: i32, %arg1: i32) -> (i32, i32, i32) {
    %c0_i32 = arith.constant 0 : i32
    %c0_i32_0 = arith.constant 0 : i32
    return %arg0, %arg1, %c0_i32 : i32, i32, i32
  }
  func.func @transform_8(%arg0: i32, %arg1: i32) -> (i32, i32, i32) {
    %c0_i32 = arith.constant 0 : i32
    %c0_i32_0 = arith.constant 0 : i32
    return %arg0, %arg1, %c0_i32 : i32, i32, i32
  }
  func.func @transform_9(%arg0: i32, %arg1: i32) -> (i32, i32, i32) {
    %c0_i32 = arith.constant 0 : i32
    %c0_i32_0 = arith.constant 0 : i32
    return %arg0, %arg1, %c0_i32 : i32, i32, i32
  }
}

module attributes {stable_mosaic.version = 11 : i64} {
  func.func @_out_residual_kernel(%arg0: i32, %arg1: memref<32x32xbf16, #tpu.memory_space<vmem>>, %arg2: memref<32x32xbf16, #tpu.memory_space<vmem>>, %arg3: memref<1x32xf32, #tpu.memory_space<vmem>>, %arg4: memref<32x32xf32, #tpu.memory_space<vmem>>, %arg5: memref<32x32xf32, #tpu.memory_space<vmem>>) attributes {dimension_semantics = [#tpu.dimension_semantics<parallel>], iteration_bounds = array<i64: 1>, scalar_prefetch = 0 : i64, scratch_operands = 0 : i64, tpu.core_type = #tpu.core_type<tc>, window_params = [{transform_indices = @transform_0, window_bounds = array<i64: 32, 32>}, {pipeline_mode = #tpu.pipeline_mode<synchronous>, transform_indices = @transform_1, window_bounds = array<i64: 32, 32>}, {pipeline_mode = #tpu.pipeline_mode<synchronous>, transform_indices = @transform_2, window_bounds = array<i64: 1, 32>}, {transform_indices = @transform_3, window_bounds = array<i64: 32, 32>}, {transform_indices = @transform_4, window_bounds = array<i64: 32, 32>}]} {
    %c0 = arith.constant 0 : index
    %c0_0 = arith.constant 0 : index
    %0 = vector.load %arg1[%c0, %c0_0] : memref<32x32xbf16, #tpu.memory_space<vmem>>, vector<32x32xbf16>
    %c0_1 = arith.constant 0 : index
    %c0_2 = arith.constant 0 : index
    %1 = vector.load %arg2[%c0_1, %c0_2] : memref<32x32xbf16, #tpu.memory_space<vmem>>, vector<32x32xbf16>
    %cst = arith.constant dense<0.000000e+00> : vector<32x32xf32>
    %2 = tpu.matmul %0, %1, %cst {dimension_numbers = #tpu.dot_dimension_numbers<[1], [0], [0], [1], [0, 0, 1, 1], [], []>} : vector<32x32xbf16>, vector<32x32xbf16>, vector<32x32xf32> -> vector<32x32xf32>
    %c0_3 = arith.constant 0 : index
    %c0_4 = arith.constant 0 : index
    %3 = vector.load %arg3[%c0_3, %c0_4] : memref<1x32xf32, #tpu.memory_space<vmem>>, vector<1x32xf32>
    %4 = vector.broadcast %3 : vector<1x32xf32> to vector<32x32xf32>
    %5 = arith.addf %2, %4 : vector<32x32xf32>
    %c0_5 = arith.constant 0 : index
    %c0_6 = arith.constant 0 : index
    %6 = vector.load %arg4[%c0_5, %c0_6] : memref<32x32xf32, #tpu.memory_space<vmem>>, vector<32x32xf32>
    %7 = arith.addf %5, %6 : vector<32x32xf32>
    %c0_7 = arith.constant 0 : index
    %c0_8 = arith.constant 0 : index
    %8 = vector.load %arg5[%c0_7, %c0_8] : memref<32x32xf32, #tpu.memory_space<vmem>>, vector<32x32xf32>
    tpu.vector_store %arg5[%c0_7, %c0_8], %7 {strides = array<i32>} : memref<32x32xf32, #tpu.memory_space<vmem>>, vector<32x32xf32>,
    return
  }
  func.func @transform_0(%arg0: i32) -> (i32, i32) {
    %c0_i32 = arith.constant 0 : i32
    %c0_i32_0 = arith.constant 0 : i32
    return %arg0, %c0_i32 : i32, i32
  }
  func.func @transform_1(%arg0: i32) -> (i32, i32) {
    %c0_i32 = arith.constant 0 : i32
    %c0_i32_0 = arith.constant 0 : i32
    %c0_i32_1 = arith.constant 0 : i32
    return %c0_i32, %c0_i32_0 : i32, i32
  }
  func.func @transform_2(%arg0: i32) -> (i32, i32) {
    %c0_i32 = arith.constant 0 : i32
    %c0_i32_0 = arith.constant 0 : i32
    %c0_i32_1 = arith.constant 0 : i32
    return %c0_i32, %c0_i32_0 : i32, i32
  }
  func.func @transform_3(%arg0: i32) -> (i32, i32) {
    %c0_i32 = arith.constant 0 : i32
    %c0_i32_0 = arith.constant 0 : i32
    return %arg0, %c0_i32 : i32, i32
  }
  func.func @transform_4(%arg0: i32) -> (i32, i32) {
    %c0_i32 = arith.constant 0 : i32
    %c0_i32_0 = arith.constant 0 : i32
    return %arg0, %c0_i32 : i32, i32
  }
}

module attributes {stable_mosaic.version = 11 : i64} {
  func.func @_ln_ffn_residual_kernel(%arg0: i32, %arg1: i32, %arg2: memref<32x32xf32, #tpu.memory_space<vmem>>, %arg3: memref<1x32xf32, #tpu.memory_space<vmem>>, %arg4: memref<1x32xf32, #tpu.memory_space<vmem>>, %arg5: memref<32x64xbf16, #tpu.memory_space<vmem>>, %arg6: memref<1x64xf32, #tpu.memory_space<vmem>>, %arg7: memref<64x32xbf16, #tpu.memory_space<vmem>>, %arg8: memref<1x32xf32, #tpu.memory_space<vmem>>, %arg9: memref<32x32xf32, #tpu.memory_space<vmem>>, %arg10: memref<32x32xbf16, #tpu.memory_space<vmem>>, %arg11: memref<32x32xf32, #tpu.memory_space<vmem>>) attributes {dimension_semantics = [#tpu.dimension_semantics<parallel>, #tpu.dimension_semantics<arbitrary>], iteration_bounds = array<i64: 1, 1>, scalar_prefetch = 0 : i64, scratch_operands = 2 : i64, tpu.core_type = #tpu.core_type<tc>, window_params = [{transform_indices = @transform_0, window_bounds = array<i64: 32, 32>}, {pipeline_mode = #tpu.pipeline_mode<synchronous>, transform_indices = @transform_1, window_bounds = array<i64: 1, 32>}, {pipeline_mode = #tpu.pipeline_mode<synchronous>, transform_indices = @transform_2, window_bounds = array<i64: 1, 32>}, {transform_indices = @transform_3, window_bounds = array<i64: 32, 64>}, {transform_indices = @transform_4, window_bounds = array<i64: 1, 64>}, {transform_indices = @transform_5, window_bounds = array<i64: 64, 32>}, {pipeline_mode = #tpu.pipeline_mode<synchronous>, transform_indices = @transform_6, window_bounds = array<i64: 1, 32>}, {transform_indices = @transform_7, window_bounds = array<i64: 32, 32>}]} {
    %c0_i32 = arith.constant 0 : i32
    %0 = arith.cmpi eq, %arg1, %c0_i32 : i32
    %1 = arith.extui %0 : i1 to i32
    %c0_i32_0 = arith.constant 0 : i32
    %2 = arith.cmpi ne, %1, %c0_i32_0 : i32
    scf.if %2 {
      %c0_16 = arith.constant 0 : index
      %c0_17 = arith.constant 0 : index
      %20 = vector.load %arg2[%c0_16, %c0_17] : memref<32x32xf32, #tpu.memory_space<vmem>>, vector<32x32xf32>
      %cst_18 = arith.constant dense<0.000000e+00> : vector<32xf32>
      %21 = vector.multi_reduction <add>, %20, %cst_18 [1] : vector<32x32xf32> to vector<32xf32>
      %22 = vector.shape_cast %21 : vector<32xf32> to vector<32x1xf32>
      %cst_19 = arith.constant 3.200000e+01 : f32
      %23 = vector.broadcast %cst_19 : f32 to vector<32x1xf32>
      %24 = arith.divf %22, %23 : vector<32x1xf32>
      %25 = vector.broadcast %24 : vector<32x1xf32> to vector<32x32xf32>
      %26 = arith.subf %20, %25 : vector<32x32xf32>
      %27 = arith.mulf %26, %26 : vector<32x32xf32>
      %cst_20 = arith.constant dense<0.000000e+00> : vector<32xf32>
      %28 = vector.multi_reduction <add>, %27, %cst_20 [1] : vector<32x32xf32> to vector<32xf32>
      %29 = vector.shape_cast %28 : vector<32xf32> to vector<32x1xf32>
      %cst_21 = arith.constant 3.200000e+01 : f32
      %30 = vector.broadcast %cst_21 : f32 to vector<32x1xf32>
      %31 = arith.divf %29, %30 : vector<32x1xf32>
      %cst_22 = arith.constant 9.99999974E-6 : f32
      %32 = vector.broadcast %cst_22 : f32 to vector<32x1xf32>
      %33 = arith.addf %31, %32 : vector<32x1xf32>
      %34 = math.rsqrt %33 : vector<32x1xf32>
      %35 = vector.broadcast %34 : vector<32x1xf32> to vector<32x32xf32>
      %36 = arith.mulf %26, %35 : vector<32x32xf32>
      %c0_23 = arith.constant 0 : index
      %c0_24 = arith.constant 0 : index
      %37 = vector.load %arg3[%c0_23, %c0_24] : memref<1x32xf32, #tpu.memory_space<vmem>>, vector<1x32xf32>
      %38 = vector.broadcast %37 : vector<1x32xf32> to vector<32x32xf32>
      %39 = arith.mulf %36, %38 : vector<32x32xf32>
      %c0_25 = arith.constant 0 : index
      %c0_26 = arith.constant 0 : index
      %40 = vector.load %arg4[%c0_25, %c0_26] : memref<1x32xf32, #tpu.memory_space<vmem>>, vector<1x32xf32>
      %41 = vector.broadcast %40 : vector<1x32xf32> to vector<32x32xf32>
      %42 = arith.addf %39, %41 : vector<32x32xf32>
      %43 = arith.truncf %42 : vector<32x32xf32> to vector<32x32xbf16>
      %c0_27 = arith.constant 0 : index
      %c0_28 = arith.constant 0 : index
      %44 = vector.load %arg10[%c0_27, %c0_28] : memref<32x32xbf16, #tpu.memory_space<vmem>>, vector<32x32xbf16>
      tpu.vector_store %arg10[%c0_27, %c0_28], %43 {strides = array<i32>} : memref<32x32xbf16, #tpu.memory_space<vmem>>, vector<32x32xbf16>,
      %cst_29 = arith.constant 0.000000e+00 : f32
      %45 = vector.broadcast %cst_29 : f32 to vector<32x32xf32>
      %c0_30 = arith.constant 0 : index
      %c0_31 = arith.constant 0 : index
      %46 = vector.load %arg11[%c0_30, %c0_31] : memref<32x32xf32, #tpu.memory_space<vmem>>, vector<32x32xf32>
      tpu.vector_store %arg11[%c0_30, %c0_31], %45 {strides = array<i32>} : memref<32x32xf32, #tpu.memory_space<vmem>>, vector<32x32xf32>,
    } else {
    }
    %c0 = arith.constant 0 : index
    %c0_1 = arith.constant 0 : index
    %3 = vector.load %arg10[%c0, %c0_1] : memref<32x32xbf16, #tpu.memory_space<vmem>>, vector<32x32xbf16>
    %c0_2 = arith.constant 0 : index
    %c0_3 = arith.constant 0 : index
    %4 = vector.load %arg5[%c0_2, %c0_3] : memref<32x64xbf16, #tpu.memory_space<vmem>>, vector<32x64xbf16>
    %cst = arith.constant dense<0.000000e+00> : vector<32x64xf32>
    %5 = tpu.matmul %3, %4, %cst {dimension_numbers = #tpu.dot_dimension_numbers<[1], [0], [0], [1], [0, 0, 1, 1], [], []>} : vector<32x32xbf16>, vector<32x64xbf16>, vector<32x64xf32> -> vector<32x64xf32>
    %c0_4 = arith.constant 0 : index
    %c0_5 = arith.constant 0 : index
    %6 = vector.load %arg6[%c0_4, %c0_5] : memref<1x64xf32, #tpu.memory_space<vmem>>, vector<1x64xf32>
    %7 = vector.broadcast %6 : vector<1x64xf32> to vector<32x64xf32>
    %8 = arith.addf %5, %7 : vector<32x64xf32>
    %cst_6 = arith.constant 0.000000e+00 : f32
    %9 = vector.broadcast %cst_6 : f32 to vector<32x64xf32>
    %10 = arith.maximumf %8, %9 : vector<32x64xf32>
    %11 = arith.truncf %10 : vector<32x64xf32> to vector<32x64xbf16>
    %c0_7 = arith.constant 0 : index
    %c0_8 = arith.constant 0 : index
    %12 = vector.load %arg11[%c0_7, %c0_8] : memref<32x32xf32, #tpu.memory_space<vmem>>, vector<32x32xf32>
    %c0_9 = arith.constant 0 : index
    %c0_10 = arith.constant 0 : index
    %13 = vector.load %arg7[%c0_9, %c0_10] : memref<64x32xbf16, #tpu.memory_space<vmem>>, vector<64x32xbf16>
    %cst_11 = arith.constant dense<0.000000e+00> : vector<32x32xf32>
    %14 = tpu.matmul %11, %13, %cst_11 {dimension_numbers = #tpu.dot_dimension_numbers<[1], [0], [0], [1], [0, 0, 1, 1], [], []>} : vector<32x64xbf16>, vector<64x32xbf16>, vector<32x32xf32> -> vector<32x32xf32>
    %15 = arith.addf %12, %14 : vector<32x32xf32>
    %c0_12 = arith.constant 0 : index
    %c0_13 = arith.constant 0 : index
    %16 = vector.load %arg11[%c0_12, %c0_13] : memref<32x32xf32, #tpu.memory_space<vmem>>, vector<32x32xf32>
    tpu.vector_store %arg11[%c0_12, %c0_13], %15 {strides = array<i32>} : memref<32x32xf32, #tpu.memory_space<vmem>>, vector<32x32xf32>,
    %c0_i32_14 = arith.constant 0 : i32
    %17 = arith.cmpi eq, %arg1, %c0_i32_14 : i32
    %18 = arith.extui %17 : i1 to i32
    %c0_i32_15 = arith.constant 0 : i32
    %19 = arith.cmpi ne, %18, %c0_i32_15 : i32
    scf.if %19 {
      %c0_16 = arith.constant 0 : index
      %c0_17 = arith.constant 0 : index
      %20 = vector.load %arg11[%c0_16, %c0_17] : memref<32x32xf32, #tpu.memory_space<vmem>>, vector<32x32xf32>
      %c0_18 = arith.constant 0 : index
      %c0_19 = arith.constant 0 : index
      %21 = vector.load %arg8[%c0_18, %c0_19] : memref<1x32xf32, #tpu.memory_space<vmem>>, vector<1x32xf32>
      %22 = vector.broadcast %21 : vector<1x32xf32> to vector<32x32xf32>
      %23 = arith.addf %20, %22 : vector<32x32xf32>
      %c0_20 = arith.constant 0 : index
      %c0_21 = arith.constant 0 : index
      %24 = vector.load %arg2[%c0_20, %c0_21] : memref<32x32xf32, #tpu.memory_space<vmem>>, vector<32x32xf32>
      %25 = arith.addf %23, %24 : vector<32x32xf32>
      %c0_22 = arith.constant 0 : index
      %c0_23 = arith.constant 0 : index
      %26 = vector.load %arg9[%c0_22, %c0_23] : memref<32x32xf32, #tpu.memory_space<vmem>>, vector<32x32xf32>
      tpu.vector_store %arg9[%c0_22, %c0_23], %25 {strides = array<i32>} : memref<32x32xf32, #tpu.memory_space<vmem>>, vector<32x32xf32>,
    } else {
    }
    return
  }
  func.func @transform_0(%arg0: i32, %arg1: i32) -> (i32, i32) {
    %c0_i32 = arith.constant 0 : i32
    %c0_i32_0 = arith.constant 0 : i32
    return %arg0, %c0_i32 : i32, i32
  }
  func.func @transform_1(%arg0: i32, %arg1: i32) -> (i32, i32) {
    %c0_i32 = arith.constant 0 : i32
    %c0_i32_0 = arith.constant 0 : i32
    %c0_i32_1 = arith.constant 0 : i32
    return %c0_i32, %c0_i32_0 : i32, i32
  }
  func.func @transform_2(%arg0: i32, %arg1: i32) -> (i32, i32) {
    %c0_i32 = arith.constant 0 : i32
    %c0_i32_0 = arith.constant 0 : i32
    %c0_i32_1 = arith.constant 0 : i32
    return %c0_i32, %c0_i32_0 : i32, i32
  }
  func.func @transform_3(%arg0: i32, %arg1: i32) -> (i32, i32) {
    %c0_i32 = arith.constant 0 : i32
    %c0_i32_0 = arith.constant 0 : i32
    return %c0_i32, %arg1 : i32, i32
  }
  func.func @transform_4(%arg0: i32, %arg1: i32) -> (i32, i32) {
    %c0_i32 = arith.constant 0 : i32
    %c0_i32_0 = arith.constant 0 : i32
    return %c0_i32, %arg1 : i32, i32
  }
  func.func @transform_5(%arg0: i32, %arg1: i32) -> (i32, i32) {
    %c0_i32 = arith.constant 0 : i32
    %c0_i32_0 = arith.constant 0 : i32
    return %arg1, %c0_i32 : i32, i32
  }
  func.func @transform_6(%arg0: i32, %arg1: i32) -> (i32, i32) {
    %c0_i32 = arith.constant 0 : i32
    %c0_i32_0 = arith.constant 0 : i32
    %c0_i32_1 = arith.constant 0 : i32
    return %c0_i32, %c0_i32_0 : i32, i32
  }
  func.func @transform_7(%arg0: i32, %arg1: i32) -> (i32, i32) {
    %c0_i32 = arith.constant 0 : i32
    %c0_i32_0 = arith.constant 0 : i32
    return %arg0, %c0_i32 : i32, i32
  }
}

</mosaic_0001>

<bundles_post_ra>
// kernel: reformer_encoder_layer.4
= control target key start
LH: loop header
LB: loop body
LE: loop exit
PB: predicated region body
PF: predicated region fallthrough
CT: control target
= control target key end

     0   :  { %vm22_vm0 = vcmask 261120   ;;  %vm171_vm1 = vcmask 523264   ;;  %s279_s0 = inlined_call_operand.vmem [shape: f32[32,32], index: 0, kind: input, shape index: {}]   ;;  %s280_s3 = inlined_call_operand.vmem [shape: bf16[32,64], index: 3, kind: input, shape index: {}]   ;;  %s281_s1 = inlined_call_operand.vmem [shape: f32[1,32], index: 1, kind: input, shape index: {}]   ;;  %s282_s2 = inlined_call_operand.vmem [shape: f32[1,32], index: 2, kind: input, shape index: {}]   ;;  %s283_s4 = inlined_call_operand.vmem [shape: f32[32,64], index: 4, kind: output, shape index: {}]  }
   0x1   :  { %v18_v0 = vld [vmem:[%s279_s0] sm:$0xff]  ;;  %v20_v1 = vld [vmem:[%s279_s0 + $0x10] sm:$0xff]  ;;  %v19_v2 = vld [vmem:[%s279_s0 + $0x8] sm:$0xff] }
   0x2   :  { %v23_v3 = vsel %vm22_vm0, %v18_v0, 0.0  ;;  %v29_v4 = vsel %vm22_vm0, %v20_v1, 0.0  ;;  %v21_v5 = vld [vmem:[%s279_s0 + $0x18] sm:$0xff]  ;;  %v26_v6 = vsel %vm22_vm0, %v19_v2, 0.0  ;;  %v198_v28 = vld [vmem:[%s280_s3] sm:$0xff]   ;;  %v199_v29 = vld [vmem:[%s280_s3 + $0x8] sm:$0xff]  }
   0x3   :  { %24 = vadd.xlane.f32.xlu0 %v23_v3  ;;  %30 = vadd.xlane.f32.xlu1 %v29_v4  ;;  %v32_v7 = vsel %vm22_vm0, %v21_v5, 0.0  ;;  %v180_v44 = vld [vmem:[%s281_s1] ss:$0 sm:$0xff] }
   0x4   :  { %190 = vmatprep.subr.bf16.mxu0 %v198_v28  ;;  %v181_v50 = vld [vmem:[%s282_s2] ss:$0 sm:$0xff] }
   0x5   :  { %191 = vmatpush3.bf16.msra.mxu0 %v198_v28 }
   0x6   :  { %192 = vmatprep.subr.bf16.mxu0 %v199_v29 }
   0x7   :  { %27 = vadd.xlane.f32.xlu0 %v26_v6  ;;  %33 = vadd.xlane.f32.xlu1 %v32_v7 }
   0x9   :  { %193 = vmatpush3.bf16.msra.mxu0 %v199_v29 }
  0x90   :  { %v25_v8 = vpop.xlane.xlu0 %24  ;;  %v31_v9 = vpop.xlane.xlu1 %30 }
  0x91   :  { %v36_v10 = vmul.f32 0.03125, %v25_v8  ;;  %v38_v11 = vmul.f32 0.03125, %v31_v9 }
  0x93   :  { %v40_v12 = vsub.f32 %v18_v0, %v36_v10  ;;  %v42_v13 = vsub.f32 %v20_v1, %v38_v11 }
  0x94   :  { %v28_v14 = vpop.xlane.xlu0 %27  ;;  %v34_v15 = vpop.xlane.xlu1 %33 }
  0x95   :  { %v37_v16 = vmul.f32 0.03125, %v28_v14  ;;  %v39_v17 = vmul.f32 0.03125, %v34_v15  ;;  %v44_v18 = vmul.f32 %v40_v12, %v40_v12  ;;  %v46_v19 = vmul.f32 %v42_v13, %v42_v13 }
  0x97   :  { %v41_v20 = vsub.f32 %v19_v2, %v37_v16  ;;  %v43_v21 = vsub.f32 %v21_v5, %v39_v17  ;;  %v48_v22 = vsel %vm22_vm0, %v44_v18, 0.0  ;;  %v54_v23 = vsel %vm22_vm0, %v46_v19, 0.0 }
  0x98   :  { %49 = vadd.xlane.f32.xlu0 %v48_v22 }
  0x99   :  { %v45_v24 = vmul.f32 %v41_v20, %v41_v20  ;;  %v47_v25 = vmul.f32 %v43_v21, %v43_v21 }
  0x9b   :  { %v51_v26 = vsel %vm22_vm0, %v45_v24, 0.0  ;;  %v57_v27 = vsel %vm22_vm0, %v47_v25, 0.0 }
  0x9c   :  { %55 = vadd.xlane.f32.xlu0 %v54_v23  ;;  %52 = vadd.xlane.f32.xlu1 %v51_v26 }
  0xa0   :  { %58 = vadd.xlane.f32.xlu1 %v57_v27 }
 0x125   :  { %v50_v30 = vpop.xlane.xlu0 %49 }
 0x126   :  { %v60_v31 = vmul.f32 0.03125, %v50_v30 }
 0x128   :  { %v64_v32 = vadd.f32 1e-05, %v60_v31 }
 0x129   :  { %v53_v33 = vpop.xlane.xlu1 %52  ;;  %v56_v34 = vpop.xlane.xlu0 %55 }
 0x12a   :  { %200 = vrsqrt.f32 %v64_v32  ;;  %v61_v35 = vmul.f32 0.03125, %v53_v33  ;;  %v62_v36 = vmul.f32 0.03125, %v56_v34 }
 0x12c   :  { %v65_v37 = vadd.f32 1e-05, %v61_v35  ;;  %v66_v38 = vadd.f32 1e-05, %v62_v36 }
 0x12d   :  { %v59_v39 = vpop.xlane.xlu1 %58 }
 0x12e   :  { %202 = vrsqrt.f32 %v65_v37  ;;  %v63_v40 = vmul.f32 0.03125, %v59_v39 }
 0x12f   :  { %204 = vrsqrt.f32 %v66_v38 }
 0x130   :  { %v67_v41 = vadd.f32 1e-05, %v63_v40 }
 0x132   :  { %206 = vrsqrt.f32 %v67_v41 }
 0x134   :  { %v201_v42 = vpop.eup %200 }
 0x135   :  { %v72_v43 = vmul.f32 %v201_v42, %v40_v12 }
 0x137   :  { %v83_v48 = vmul.f32 %v180_v44, %v72_v43 }
 0x138   :  { %v203_v45 = vpop.eup %202 }
 0x139   :  { %v205_v46 = vpop.eup %204  ;;  %v73_v47 = vmul.f32 %v203_v45, %v41_v20  ;;  %v94_v54 = vadd.f32 %v181_v50, %v83_v48 }
 0x13a   :  { %v74_v49 = vmul.f32 %v205_v46, %v42_v13 }
 0x13b   :  { %v84_v51 = vmul.f32 %v180_v44, %v73_v47 }
 0x13c   :  { %v207_v52 = vpop.eup %206  ;;  %v85_v56 = vmul.f32 %v180_v44, %v74_v49 }
 0x13d   :  { %v75_v53 = vmul.f32 %v207_v52, %v43_v21  ;;  %v95_v55 = vadd.f32 %v181_v50, %v84_v51 }
 0x13e   :  { %v96_v59 = vadd.f32 %v181_v50, %v85_v56 }
 0x13f   :  { %v98_v57 = vpack.c.bf16 %v95_v55, %v94_v54  ;;  %v86_v58 = vmul.f32 %v180_v44, %v75_v53 }
 0x141   :  { %194 = vmatprep.mubr.msk.bf16.mxu0 %vm22_vm0, %v98_v57  ;;  %v97_v60 = vadd.f32 %v181_v50, %v86_v58 }
 0x143   :  { %v99_v61 = vpack.c.bf16 %v97_v60, %v96_v59 }
 0x145   :  { %195 = vmatmul.mubr.msk.bf16.vlgmr.msra.gmra.mrb[0].mxu0 %vm22_vm0, %v99_v61 }
 0x218   :  { %v196_v62 = vpop.f32.mrb[0].mxu0 }
 0x219   :  { %174 = vst.msk [vmem:[%s283_s4 + $0x10] sm:$0xff] %vm171_vm1, %v196_v62  ;;  %v156_v63 = vpop.f32.mrb[1].mxu0 }
 0x21a   :  { %172 = vst.msk [vmem:[%s283_s4] sm:$0xff] %vm171_vm1, %v156_v63  ;;  %v197_v0 = vpop.f32.mrb[2].mxu0 }
 0x21b   :  { %175 = vst.msk [vmem:[%s283_s4 + $0x18] sm:$0xff] %vm171_vm1, %v197_v0  ;;  %v159_v1 = vpop.f32.mrb[3].mxu0 }
 0x21c   :  { %173 = vst.msk [vmem:[%s283_s4 + $0x8] sm:$0xff] %vm171_vm1, %v159_v1 }

// kernel: reformer_encoder_layer.5
= control target key start
LH: loop header
LB: loop body
LE: loop exit
PB: predicated region body
PF: predicated region fallthrough
CT: control target
= control target key end

     0   :  { %s3072_s30 = smov 0   ;;  %s3074_s10 = smov 0   ;;  %s3647_s0 = inlined_call_operand.vmem [shape: bf16[8,8,4,8], index: 0, kind: input, shape index: {}, may-alias: {0,2}]   ;;  %s3648_s1 = inlined_call_operand.vmem [shape: bf16[8,8,4,8], index: 1, kind: input, shape index: {}, may-alias: {1,3}]   ;;  %s3649_s2 = inlined_call_operand.vmem [shape: bf16[8,8,4,8], index: 2, kind: input, shape index: {}, may-alias: {0,2}]   ;;  %s3650_s3 = inlined_call_operand.vmem [shape: bf16[8,8,4,8], index: 3, kind: input, shape index: {}, may-alias: {1,3}]   ;;  %s3651_s4 = inlined_call_operand.vmem [shape: s32[8,8,4], index: 4, kind: input, shape index: {}]   ;;  %s3652_s5 = inlined_call_operand.vmem [shape: s32[8,8,8], index: 5, kind: input, shape index: {}]   ;;  %s3653_s6 = inlined_call_operand.vmem [shape: f32[8,8,4], index: 6, kind: input, shape index: {}]   ;;  %s3654_s7 = inlined_call_operand.vmem [shape: f32[8,8,8], index: 7, kind: input, shape index: {}]   ;;  %s3655_s8 = inlined_call_operand.vmem [shape: f32[8,8,32], index: 8, kind: output, shape index: {0}]   ;;  %s3656_s9 = inlined_call_operand.vmem [shape: f32[8,8,4], index: 9, kind: output, shape index: {1}]  }
   0x1   :  { %s3076_s11 = smov 0  }
   0x2 LB: > { %s32_s12 = sadd.s32 1, %s3007_s10  ;;  %p2693_p0 = scmp.ge.s32.totalorder %s3011_s11, 1  ;;  %s3011_s11 = sphi %s3076_s11, %s20_s11   ;;  %s3007_s10 = sphi %s3074_s10, %s3672_s10   ;;  %s3003_s30 = sphi %s3072_s30, %s3671_s30  }
   0x3   : > { %p34_p1 = scmp.ge.s32.totalorder %s32_s12, 8  ;;  %p528_p2 = scmp.lt.s32.totalorder %s3011_s11, 9 }
   0x5   : > { %s3674_s12 = smov (%p34_p1, %s32_s12), 0  ;;  %p529_p3 = pnand %p2693_p0, %p528_p2 }
   0x6   : > { %p659_p4 = scmp.lt.s32.totalorder (!%p529_p3), %s3003_s30, 7  ;;  %vm827_vm0 = vcmask (!%p529_p3), 60416   ;;  %v3013_v36 = vmov (!%p529_p3), 0.0   ;;  %vm3014_vm1 = vmmov (!%p529_p3), 0   ;;  %v1018_v37 = vlaneseq (!%p529_p3)  ;;  %s3019_s26 = smov (!%p529_p3), 16  }
   0x7   : > { %532 = sbr.rel (%p529_p3) target bundleno = 1117 (0x45d), region = 52  ;;  %2772 = vmatprep.subr.bf16.mxu1 (!%p529_p3), %v3013_v36  ;;  %2766 = vmatprep.subr.bf16.mxu0 (!%p529_p3), %v3013_v36  ;;  %s3021_s28 = smov (!%p529_p3), 24  }
   0x8   : > { %2774 = vmatprep.mubr.msk.bf16.mxu1 (!%p529_p3), %vm3014_vm1, %v3013_v36  ;;  %2768 = vmatprep.mubr.msk.bf16.mxu0 (!%p529_p3), %vm3014_vm1, %v3013_v36  ;;  %v3201_v38 = vshrl.u32 (!%p529_p3), %v1018_v37, 7 }
   0xa   : > { %v3208_v40 = vsub.s32 (!%p529_p3), 0, %v3201_v38  ;;  %v1473_v41 = vsub.s32 (!%p529_p3), 1, %v3201_v38  ;;  %v1487_v42 = vsub.s32 (!%p529_p3), 3, %v3201_v38  ;;  %v1480_v49 = vsub.s32 (!%p529_p3), 2, %v3201_v38 }
   0xb   : > { %v1501_v51 = vsub.s32 (!%p529_p3), 5, %v3201_v38  ;;  %v1494_v55 = vsub.s32 (!%p529_p3), 4, %v3201_v38  ;;  %v1515_v57 = vsub.s32 (!%p529_p3), 7, %v3201_v38  ;;  %v1508_v61 = vsub.s32 (!%p529_p3), 6, %v3201_v38 }
   0xe   : > { %s3676_s30 = smov (!%p659_p4, %s3003_s30), 7 }
   0xf   : > { %s3093_s13 = sshll.u32 %s3676_s30, 4  ;;  %s3194_s24 = sshll.u32 %s3676_s30, 3 }
  0x10   : > { %s3099_s16 = scalar_lea.vmem %s3647_s0, %s3093_s13  ;;  %s2729_s17 = sadd.s32 14, %s3093_s13 }
  0x11   : > { %v3103_v0 = vld [vmem:[%s3099_s16 + $0x2] sm:$0x3]  ;;  %v3106_v1 = vld [vmem:[%s3099_s16] sm:$0x3]  ;;  %v3109_v2 = vld [vmem:[%s3099_s16 + $0x4] sm:$0x3]  ;;  %s699_s20 = scalar_lea.vmem %s3649_s2, %s2729_s17  ;;  %s3117_s23 = scalar_lea.vmem %s3650_s3, %s2729_s17 }
  0x12   : > { %v3120_v3 = vunpack.c.l.bf16 %v3103_v0  ;;  %v3123_v4 = vunpack.c.l.bf16 %v3106_v1  ;;  %v3126_v5 = vunpack.c.l.bf16 %v3109_v2  ;;  %v809_v6 = vld [vmem:[%s699_s20] sm:$0x3]  ;;  %v3129_v7 = vld [vmem:[%s3099_s16 + $0x6] sm:$0x3]  ;;  %v3137_v10 = vld [vmem:[%s3099_s16 + $0x8] sm:$0x3]  ;;  %s770_s27 = scalar_lea.vmem %s3653_s6, %s3194_s24  ;;  %s756_s14 = scalar_lea.vmem %s3651_s4, %s3194_s24 }
  0x13   : > { %v3131_v8 = vunpack.c.l.bf16 %v809_v6  ;;  %v3134_v9 = vunpack.c.l.bf16 %v3129_v7  ;;  %v3146_v14 = vunpack.c.l.bf16 %v3137_v10  ;;  %v3149_v15 = vld [vmem:[%s3099_s16 + $0xa] sm:$0x3]  ;;  %v3154_v17 = vld [vmem:[%s3099_s16 + $0xc] sm:$0x3]  ;;  %v3171_v26 = vld [vmem:[%s3099_s16 + $0xe] sm:$0x3]  ;;  %s777_s16 = scalar_lea.vmem %s3654_s7, %s3194_s24  ;;  %s763_s19 = scalar_lea.vmem %s3652_s5, %s3194_s24 }
  0x14   : > { %v820_v11 = vmul.f32 %v3120_v3, %v3120_v3  ;;  %v819_v12 = vmul.f32 %v3123_v4, %v3123_v4  ;;  %v821_v13 = vmul.f32 %v3126_v5, %v3126_v5  ;;  %v3161_v21 = vunpack.c.l.bf16 %v3149_v15  ;;  %v1463_v39 = vld [vmem:[%s770_s27] sm:$0xff]  ;;  %s3521_s22 = scalar_lea.vmem %s3648_s1, %s3093_s13  ;;  %s791_s25 = scalar_lea.vmem %s3656_s9, %s3194_s24 }
  0x15   : > { %v949_v16 = vmul.f32 %v3131_v8, %v3131_v8  ;;  %v822_v20 = vmul.f32 %v3134_v9, %v3134_v9  ;;  %v823_v24 = vmul.f32 %v3146_v14, %v3146_v14  ;;  %v3168_v25 = vunpack.c.l.bf16 %v3154_v17  ;;  %v1675_v43 = vld [vmem:[%s756_s14] sm:$0xff]  ;;  %s3020_s27 = smov 8   ;;  %s784_s30 = scalar_lea.vmem %s3655_s8, %s3194_s24 }
  0x16   : > { %v831_v18 = vsel %vm827_vm0, %v820_v11, 0.0  ;;  %v828_v19 = vsel %vm827_vm0, %v819_v12, 0.0  ;;  %v834_v22 = vsel %vm827_vm0, %v821_v13, 0.0  ;;  %v824_v29 = vmul.f32 %v3161_v21, %v3161_v21 }
  0x17   : > { %832 = vadd.xlane.f32.xlu1 %v831_v18  ;;  %829 = vadd.xlane.f32.xlu0 %v828_v19  ;;  %v950_v23 = vsel %vm827_vm0, %v949_v16, 0.0  ;;  %v837_v27 = vsel %vm827_vm0, %v822_v20, 0.0  ;;  %v840_v28 = vsel %vm827_vm0, %v823_v24, 0.0  ;;  %v825_v30 = vmul.f32 %v3168_v25, %v3168_v25 }
  0x18   : > { %v3180_v31 = vunpack.c.l.bf16 %v3171_v26  ;;  %v843_v32 = vsel %vm827_vm0, %v824_v29, 0.0  ;;  %v1467_v44 = vrot.slane %v1463_v39, %v3208_v40  ;;  %v1474_v45 = vrot.slane %v1463_v39, %v1473_v41 }
  0x19   : > { %v846_v33 = vsel %vm827_vm0, %v825_v30, 0.0  ;;  %v1679_v46 = vrot.slane %v1675_v43, %v3208_v40  ;;  %v1488_v47 = vrot.slane %v1463_v39, %v1487_v42  ;;  %v1686_v48 = vrot.slane %v1675_v43, %v1473_v41 }
  0x1a   : > { %v826_v34 = vmul.f32 %v3180_v31, %v3180_v31  ;;  %v1700_v50 = vrot.slane %v1675_v43, %v1487_v42  ;;  %v1481_v52 = vrot.slane %v1463_v39, %v1480_v49  ;;  %v1502_v53 = vrot.slane %v1463_v39, %v1501_v51 }
  0x1b   : > { %835 = vadd.xlane.f32.xlu1 %v834_v22  ;;  %951 = vadd.xlane.f32.xlu0 %v950_v23  ;;  %v1693_v54 = vrot.slane %v1675_v43, %v1480_v49  ;;  %v1714_v56 = vrot.slane %v1675_v43, %v1501_v51  ;;  %v1495_v58 = vrot.slane %v1463_v39, %v1494_v55 }
  0x1c   : > { %v849_v35 = vsel %vm827_vm0, %v826_v34, 0.0  ;;  %v1516_v59 = vrot.slane %v1463_v39, %v1515_v57  ;;  %v1707_v60 = vrot.slane %v1675_v43, %v1494_v55  ;;  %v1728_v62 = vrot.slane %v1675_v43, %v1515_v57 }
  0x1d   : > { %v1509_v63 = vrot.slane %v1463_v39, %v1508_v61  ;;  %v1721_v6 = vrot.slane %v1675_v43, %v1508_v61 }
  0x1f   : > { %838 = vadd.xlane.f32.xlu0 %v837_v27  ;;  %841 = vadd.xlane.f32.xlu1 %v840_v28 }
  0x23   : > { %844 = vadd.xlane.f32.xlu0 %v843_v32  ;;  %847 = vadd.xlane.f32.xlu1 %v846_v33 }
  0x27   : > { %850 = vadd.xlane.f32.xlu0 %v849_v35 }
  0x34   : > { %1469 = vbcast.lane.b32.xlu1 %v1467_v44, 256 }
  0x38   : > { %1681 = vbcast.lane.b32.xlu1 %v1679_v46, 256 }
  0x3c   : > { %1688 = vbcast.lane.b32.xlu1 %v1686_v48, 256 }
  0x3d   : > { %1476 = vbcast.lane.b32.xlu0 %v1474_v45, 256 }
  0x40   : > { %1483 = vbcast.lane.b32.xlu1 %v1481_v52, 256 }
  0x41   : > { %1490 = vbcast.lane.b32.xlu0 %v1488_v47, 256 }
  0x44   : > { %1695 = vbcast.lane.b32.xlu1 %v1693_v54, 256 }
  0x45   : > { %1702 = vbcast.lane.b32.xlu0 %v1700_v50, 256 }
  0x48   : > { %1497 = vbcast.lane.b32.xlu1 %v1495_v58, 256 }
  0x49   : > { %1504 = vbcast.lane.b32.xlu0 %v1502_v53, 256 }
  0x4c   : > { %1709 = vbcast.lane.b32.xlu1 %v1707_v60, 256 }
  0x4d   : > { %1716 = vbcast.lane.b32.xlu0 %v1714_v56, 256 }
  0x50   : > { %1511 = vbcast.lane.b32.xlu1 %v1509_v63, 256 }
  0x51   : > { %1518 = vbcast.lane.b32.xlu0 %v1516_v59, 256 }
  0x54   : > { %1723 = vbcast.lane.b32.xlu1 %v1721_v6, 256 }
  0x55   : > { %1730 = vbcast.lane.b32.xlu0 %v1728_v62, 256 }
  0xa4   : > { %v833_v11 = vpop.xlane.xlu1 %832  ;;  %v830_v12 = vpop.xlane.xlu0 %829 }
  0xa5   : > { %2905 = vrsqrt.f32 %v833_v11  ;;  %vm861_vm2 = vcmp.eq.f32.partialorder %v833_v11, inf  ;;  %vm863_vm3 = vcmp.eq.f32.partialorder %v833_v11, 0.0  ;;  %v864_v24 = vand.u32 2147483648, %v833_v11 }
  0xa6   : > { %2907 = vrsqrt.f32 %v830_v12  ;;  %vm854_vm4 = vcmp.eq.f32.partialorder %v830_v12, inf  ;;  %vm856_vm5 = vcmp.eq.f32.partialorder %v830_v12, 0.0  ;;  %v857_v30 = vand.u32 2147483648, %v830_v12 }
  0xa8   : > { %v836_v13 = vpop.xlane.xlu1 %835  ;;  %v952_v16 = vpop.xlane.xlu0 %951 }
  0xa9   : > { %2909 = vrsqrt.f32 %v836_v13  ;;  %vm868_vm6 = vcmp.eq.f32.partialorder %v836_v13, inf  ;;  %vm870_vm7 = vcmp.eq.f32.partialorder %v836_v13, 0.0  ;;  %v871_v33 = vand.u32 2147483648, %v836_v13 }
  0xaa   : > { %2911 = vrsqrt.f32 %v952_v16  ;;  %vm955_vm8 = vcmp.eq.f32.partialorder %v952_v16, inf  ;;  %vm957_vm9 = vcmp.eq.f32.partialorder %v952_v16, 0.0  ;;  %v958_v43 = vand.u32 2147483648, %v952_v16 }
  0xac   : > { %v839_v18 = vpop.xlane.xlu0 %838  ;;  %v3219_v19 = vpop.xlane.xlu1 %841 }
  0xad   : > { %2913 = vrsqrt.f32 %v839_v18  ;;  %vm875_vm10 = vcmp.eq.f32.partialorder %v839_v18, inf  ;;  %vm877_vm11 = vcmp.eq.f32.partialorder %v839_v18, 0.0  ;;  %v878_v49 = vand.u32 2147483648, %v839_v18 }
  0xae   : > { %2915 = vrsqrt.f32 %v3219_v19  ;;  %vm882_vm12 = vcmp.eq.f32.partialorder %v3219_v19, inf  ;;  %v885_v54 = vand.u32 2147483648, %v3219_v19  ;;  %vm884_vm13 = vcmp.eq.f32.partialorder %v3219_v19, 0.0 }
  0xaf   : > { %v2906_v20 = vpop.eup %2905 }
  0xb0   : > { %v2908_v22 = vpop.eup %2907  ;;  %v860_v23 = vmul.f32 %v2906_v20, %v833_v11  ;;  %v3222_v27 = vpop.xlane.xlu0 %844 }
  0xb1   : > { %v3224_v28 = vpop.xlane.xlu1 %847  ;;  %v853_v29 = vmul.f32 %v2908_v22, %v830_v12  ;;  %2917 = vrsqrt.f32 %v3222_v27  ;;  %vm889_vm14 = vcmp.eq.f32.partialorder %v3222_v27, inf  ;;  %vm891_vm15 = vcmp.eq.f32.partialorder %v3222_v27, 0.0 }
  0xb2   : > { %v862_v32 = vsel %vm861_vm2, %v833_v11, %v860_v23  ;;  %2919 = vrsqrt.f32 %v3224_v28  ;;  %v892_v62 = vand.u32 2147483648, %v3222_v27  ;;  %vm896_vm2 = vcmp.eq.f32.partialorder %v3224_v28, inf }
  0xb3   : > { %v2910_v34 = vpop.eup %2909  ;;  %v855_v35 = vsel %vm854_vm4, %v830_v12, %v853_v29  ;;  %v865_v39 = vsel %vm863_vm3, %v864_v24, %v862_v32  ;;  %v899_v22 = vand.u32 2147483648, %v3224_v28  ;;  %vm898_vm3 = vcmp.eq.f32.partialorder %v3224_v28, 0.0 }
  0xb4   : > { %v2912_v41 = vpop.eup %2911  ;;  %v867_v42 = vmul.f32 %v2910_v34, %v836_v13  ;;  %v851_v44 = vpop.xlane.xlu0 %850  ;;  %v858_v45 = vsel %vm856_vm5, %v857_v30, %v855_v35  ;;  %v909_v46 = vmax.f32 %v865_v39, 1e-12 }
  0xb5   : > { %v954_v47 = vmul.f32 %v2912_v41, %v952_v16  ;;  %2921 = vrsqrt.f32 %v851_v44  ;;  %v908_v50 = vmax.f32 %v858_v45, 1e-12  ;;  %vm903_vm4 = vcmp.eq.f32.partialorder %v851_v44, inf }
  0xb6   : > { %v869_v48 = vsel %vm868_vm6, %v836_v13, %v867_v42  ;;  %2923 = vrcp.f32 %v909_v46  ;;  %v906_v32 = vand.u32 2147483648, %v851_v44  ;;  %vm905_vm5 = vcmp.eq.f32.partialorder %v851_v44, 0.0 }
  0xb7   : > { %v2914_v51 = vpop.eup %2913  ;;  %v872_v52 = vsel %vm870_vm7, %v871_v33, %v869_v48  ;;  %v956_v53 = vsel %vm955_vm8, %v952_v16, %v954_v47  ;;  %2925 = vrcp.f32 %v908_v50  ;;  %vm981_vm6 = vcmask 1041408  }
  0xb8   : > { %v2916_v55 = vpop.eup %2915  ;;  %v910_v56 = vmax.f32 %v872_v52, 1e-12  ;;  %v874_v57 = vmul.f32 %v2914_v51, %v839_v18  ;;  %v959_v58 = vsel %vm957_vm9, %v958_v43, %v956_v53  ;;  %vm1102_vm7 = vcmask 64512  }
  0xb9   : > { %v881_v59 = vmul.f32 %v2916_v55, %v3219_v19  ;;  %v960_v60 = vmax.f32 %v959_v58, 1e-12 }
  0xba   : > { %2927 = vrcp.f32 %v910_v56  ;;  %v876_v61 = vsel %vm875_vm10, %v839_v18, %v874_v57 }
  0xbb   : > { %v2918_v63 = vpop.eup %2917  ;;  %v879_v6 = vsel %vm877_vm11, %v878_v49, %v876_v61  ;;  %v883_v11 = vsel %vm882_vm12, %v3219_v19, %v881_v59  ;;  %2929 = vrcp.f32 %v960_v60 }
  0xbc   : > { %v2920_v12 = vpop.eup %2919  ;;  %v911_v13 = vmax.f32 %v879_v6, 1e-12  ;;  %v886_v16 = vsel %vm884_vm13, %v885_v54, %v883_v11  ;;  %v888_v20 = vmul.f32 %v2918_v63, %v3222_v27 }
  0xbd   : > { %v912_v23 = vmax.f32 %v886_v16, 1e-12  ;;  %v895_v24 = vmul.f32 %v2920_v12, %v3224_v28 }
  0xbe   : > { %v890_v18 = vsel %vm889_vm14, %v3222_v27, %v888_v20  ;;  %2931 = vrcp.f32 %v911_v13 }
  0xbf   : > { %v2922_v19 = vpop.eup %2921  ;;  %2933 = vrcp.f32 %v912_v23  ;;  %v893_v29 = vsel %vm891_vm15, %v892_v62, %v890_v18  ;;  %v897_v30 = vsel %vm896_vm2, %v3224_v28, %v895_v24 }
  0xc0   : > { %v2924_v33 = vpop.eup %2923  ;;  %v913_v34 = vmax.f32 %v893_v29, 1e-12  ;;  %v900_v35 = vsel %vm898_vm3, %v899_v22, %v897_v30  ;;  %v902_v39 = vmul.f32 %v2922_v19, %v851_v44 }
  0xc1   : > { %v919_v41 = vmul.f32 0.35355338, %v2924_v33  ;;  %v2926_v42 = vpop.eup %2925  ;;  %v914_v43 = vmax.f32 %v900_v35, 1e-12 }
  0xc2   : > { %v904_v45 = vsel %vm903_vm4, %v851_v44, %v902_v39  ;;  %2935 = vrcp.f32 %v913_v34  ;;  %v917_v47 = vmul.f32 0.35355338, %v2926_v42 }
  0xc3   : > { %v907_v46 = vsel %vm905_vm5, %v906_v32, %v904_v45  ;;  %v933_v28 = vmul.f32 %v919_v41, %v3120_v3  ;;  %2937 = vrcp.f32 %v914_v43 }
  0xc4   : > { %v2928_v48 = vpop.eup %2927  ;;  %v915_v27 = vmax.f32 %v907_v46, 1e-12  ;;  %v932_v50 = vmul.f32 %v917_v47, %v3123_v4 }
  0xc5   : > { %v2930_v49 = vpop.eup %2929  ;;  %v921_v51 = vmul.f32 0.35355338, %v2928_v48  ;;  %v941_v57 = vpack.c.bf16 %v933_v28, %v933_v28  ;;  %v1470_v28 = vpop.permute.xlu1 %1469 }
  0xc6   : > { %v962_v52 = vmul.f32 0.35355338, %v2930_v49  ;;  %v940_v53 = vpack.c.bf16 %v932_v50, %v932_v50  ;;  %2939 = vrcp.f32 %v915_v27  ;;  %vm1520_vm2 = vcmp.gt.f32.partialorder %v1470_v28, 0.5 }
  0xc7   : > { %v934_v54 = vmul.f32 %v921_v51, %v3126_v5  ;;  %v975_v19 = vrot.slane %v941_v57, 6  ;;  %v1732_v51 = vld [vmem:[%s763_s19] sm:$0xff] }
  0xc8   : > { %v2932_v55 = vpop.eup %2931  ;;  %v963_v44 = vmul.f32 %v962_v52, %v3131_v8  ;;  %v974_v58 = vrot.slane %v940_v53, 6 }
  0xc9   : > { %v2934_v56 = vpop.eup %2933  ;;  %v923_v59 = vmul.f32 0.35355338, %v2932_v55  ;;  %v942_v62 = vpack.c.bf16 %v934_v54, %v934_v54 }
  0xca   : > { %v964_v60 = vpack.c.bf16 %v963_v44, %v963_v44  ;;  %v925_v4 = vmul.f32 0.35355338, %v2934_v56  ;;  %v987_v3 = vsel %vm981_vm6, %v941_v57, %v974_v58  ;;  %v1477_v44 = vpop.permute.xlu0 %1476 }
  0xcb   : > { %v935_v61 = vmul.f32 %v923_v59, %v3134_v9  ;;  %v1151_v5 = vsel %vm1102_vm7, %v987_v3, 0  ;;  %v976_v20 = vrot.slane %v942_v62, 6  ;;  %v990_v30 = vsel %vm981_vm6, %v942_v62, %v975_v19 }
  0xcc   : > { %v2936_v63 = vpop.eup %2935  ;;  %v973_v6 = vrot.slane %v964_v60, 6  ;;  %2773 = vmatpush3.bf16.xpose.msra.mxu1 %v1151_v5  ;;  %v936_v12 = vmul.f32 %v925_v4, %v3146_v14  ;;  %v3016_v59 = vmov 0   ;;  %vm1521_vm10 = vcmp.gt.f32.partialorder %v1477_v44, 0.5 }
  0xcd   : > { %v943_v11 = vpack.c.bf16 %v935_v61, %v935_v61  ;;  %v927_v8 = vmul.f32 0.35355338, %v2936_v63  ;;  %2784 = vmatprep.subr.bf16.mxu1 %v3013_v36  ;;  %v2938_v22 = vpop.eup %2937 }
  0xce   : > { %v984_v13 = vsel %vm981_vm6, %v940_v53, %v973_v6  ;;  %v944_v24 = vpack.c.bf16 %v936_v12, %v936_v12  ;;  %v929_v29 = vmul.f32 0.35355338, %v2938_v22  ;;  %v1682_v53 = vpop.permute.xlu1 %1681  ;;  %v3341_v3 = vpop.permute.xlu0 %1490  ;;  %v1733_v12 = vcombine.high %v1732_v51, %v1732_v51 }
  0xcf   : > { %v1106_v16 = vsel %vm1102_vm7, %v984_v13, 0  ;;  %v993_v9 = vsel %vm981_vm6, %v943_v11, %v976_v20  ;;  %v937_v23 = vmul.f32 %v927_v8, %v3161_v21  ;;  %v1196_v21 = vsel %vm1102_vm7, %v990_v30, 0 }
  0xd0   : > { %2767 = vmatpush3.bf16.xpose.msra.mxu0 %v1106_v16  ;;  %v2940_v18 = vpop.eup %2939  ;;  %v1241_v14 = vsel %vm1102_vm7, %v993_v9, 0  ;;  %v978_v33 = vrot.slane %v944_v24, 6  ;;  %v977_v35 = vrot.slane %v943_v11, 6 }
  0xd1   : > { %2778 = vmatprep.subr.bf16.mxu0 %v3013_v36  ;;  %v945_v32 = vpack.c.bf16 %v937_v23, %v937_v23  ;;  %v931_v34 = vmul.f32 0.35355338, %v2940_v18 }
  0xd2   : > { %v996_v43 = vsel %vm981_vm6, %v944_v24, %v977_v35  ;;  %v1689_v58 = vpop.permute.xlu1 %1688  ;;  %v3354_v22 = vpop.permute.xlu0 %1702 }
  0xd3   : > { %2775 = vmatmul.mubr.msk.bf16.vlgmr.msra.gmra.mrb[0].mxu1 %vm1102_vm7, %v3103_v0  ;;  %v938_v0 = vmul.f32 %v929_v29, %v3168_v25  ;;  %v999_v39 = vsel %vm981_vm6, %v945_v32, %v978_v33  ;;  %v939_v41 = vmul.f32 %v931_v34, %v3180_v31  ;;  %v1286_v31 = vsel %vm1102_vm7, %v996_v43, 0 }
  0xd4   : > { %2785 = vmatpush3.bf16.xpose.msra.mxu1 %v1241_v14  ;;  %2786 = vmatprep.mubr.msk.bf16.mxu1 %vm3014_vm1, %v3013_v36 }
  0xd5   : > { %2796 = vmatprep.subr.bf16.mxu1 %v3013_v36  ;;  %v946_v42 = vpack.c.bf16 %v938_v0, %v938_v0  ;;  %v947_v25 = vpack.c.bf16 %v939_v41, %v939_v41 }
  0xd6   : > { %v3347_v63 = vpop.permute.xlu1 %1483  ;;  %v1505_v35 = vpop.permute.xlu0 %1504 }
  0xd7   : > { %2769 = vmatmul.mubr.msk.bf16.vlgmr.msra.gmra.mrb[0].mxu0 %vm1102_vm7, %v3106_v1  ;;  %v1331_v1 = vsel %vm1102_vm7, %v999_v39, 0  ;;  %v980_v45 = vrot.slane %v946_v42, 6 }
  0xd8   : > { %2779 = vmatpush3.bf16.xpose.msra.mxu0 %v1196_v21  ;;  %2780 = vmatprep.mubr.msk.bf16.mxu0 %vm3014_vm1, %v3013_v36 }
  0xd9   : > { %2790 = vmatprep.subr.bf16.mxu0 %v3013_v36  ;;  %v1005_v46 = vsel %vm981_vm6, %v947_v25, %v980_v45 }
  0xda   : > { %v1421_v47 = vsel %vm1102_vm7, %v1005_v46, 0  ;;  %v3357_v23 = vpop.permute.xlu1 %1695 }
  0xdb   : > { %2787 = vmatmul.mubr.msk.bf16.vlgmr.msra.gmra.mrb[4].mxu1 %vm1102_vm7, %v3129_v7  ;;  %v979_v7 = vrot.slane %v945_v32, 6 }
  0xdc   : > { %2797 = vmatpush3.bf16.xpose.msra.mxu1 %v1331_v1  ;;  %2798 = vmatprep.mubr.msk.bf16.mxu1 %vm3014_vm1, %v3013_v36 }
  0xdd   : > { %2808 = vmatprep.subr.bf16.mxu1 %v3013_v36  ;;  %v1002_v48 = vsel %vm981_vm6, %v946_v42, %v979_v7 }
  0xdf   : > { %2781 = vmatmul.mubr.msk.bf16.vlgmr.msra.gmra.mrb[4].mxu0 %vm1102_vm7, %v3109_v2  ;;  %v1376_v2 = vsel %vm1102_vm7, %v1002_v48, 0 }
  0xe0   : > { %2791 = vmatpush3.bf16.xpose.msra.mxu0 %v1286_v31  ;;  %2792 = vmatprep.mubr.msk.bf16.mxu0 %vm3014_vm1, %v3013_v36 }
  0xe1   : > { %2802 = vmatprep.subr.bf16.mxu0 %v3013_v36 }
  0xe3   : > { %2799 = vmatmul.mubr.msk.bf16.vlgmr.msra.gmra.mrb[8].mxu1 %vm1102_vm7, %v3149_v15 }
  0xe4   : > { %2809 = vmatpush3.bf16.xpose.msra.mxu1 %v1421_v47  ;;  %2810 = vmatprep.mubr.msk.bf16.mxu1 %vm3014_vm1, %v3013_v36  ;;  %v1498_v47 = vpop.permute.xlu1 %1497 }
  0xe5   : > { %2820 = vmatprep.subr.bf16.mxu1 %v3013_v36 }
  0xe7   : > { %2793 = vmatmul.mubr.msk.bf16.vlgmr.msra.gmra.mrb[8].mxu0 %vm1102_vm7, %v3137_v10  ;;  %v3015_v10 = vmov 1966171168  }
  0xe8   : > { %2803 = vmatpush3.bf16.xpose.msra.mxu0 %v1376_v2  ;;  %2804 = vmatprep.mubr.msk.bf16.mxu0 %vm3014_vm1, %v3013_v36  ;;  %v1532_v15 = vunpack.c.l.s4 %v3015_v10 }
  0xe9   : > { %2814 = vmatprep.subr.bf16.mxu0 %v3013_v36 }
  0xea   : > { %v1533_v27 = vunpack.c.0.s8 %v1532_v15 }
  0xeb   : > { %2811 = vmatmul.mubr.msk.bf16.vlgmr.msra.gmra.mrb[12].mxu1 %vm1102_vm7, %v3171_v26  ;;  %v1528_v26 = vld [vmem:[%s777_s16] sm:$0xff] }
  0xec   : > { %2822 = vmatprep.mubr.msk.bf16.mxu1 %vm3014_vm1, %v3013_v36  ;;  %v3329_v49 = vsub.s32 %v1533_v27, %v3201_v38  ;;  %v1530_v55 = vcombine.high %v1528_v26, %v1528_v26 }
  0xee   : > { %v1537_v50 = vrot.slane %v1528_v26, %v3329_v49  ;;  %v1740_v54 = vrot.slane %v1732_v51, %v3329_v49  ;;  %v1544_v4 = vrot.slane %v1530_v55, %v3329_v49  ;;  %v1747_v24 = vrot.slane %v1733_v12, %v3329_v49 }
  0xef   : > { %2805 = vmatmul.mubr.msk.bf16.vlgmr.msra.gmra.mrb[12].mxu0 %vm1102_vm7, %v3154_v17 }
  0xf0   : > { %2816 = vmatprep.mubr.msk.bf16.mxu0 %vm3014_vm1, %v3013_v36  ;;  %v1545_v17 = vcombine.high %v1537_v50, %v1537_v50  ;;  %v1553_v56 = vrot.slane %v1537_v50, %v3329_v49  ;;  %v1748_v57 = vcombine.high %v1740_v54, %v1740_v54  ;;  %v1546_v8 = vcombine.high %v1544_v4, %v1544_v4 }
  0xf1   : > { %v1756_v13 = vrot.slane %v1740_v54, %v3329_v49  ;;  %v1560_v30 = vrot.slane %v1544_v4, %v3329_v49  ;;  %v1749_v41 = vcombine.high %v1747_v24, %v1747_v24  ;;  %v1717_v54 = vpop.permute.xlu0 %1716  ;;  %v1710_v4 = vpop.permute.xlu1 %1709 }
  0xf2   : > { %v1567_v52 = vrot.slane %v1545_v17, %v3329_v49  ;;  %vm1587_vm9 = vcmp.gt.f32.partialorder %v1553_v56, 0.5  ;;  %v3344_v61 = vrot.slane %v1748_v57, %v3329_v49  ;;  %v1575_v11 = vcombine.high %v1553_v56, %v1553_v56 }
  0xf3   : > { %v1611_v6 = vsel %vm1587_vm9, 1, %v3016_v59  ;;  %v1574_v9 = vrot.slane %v1546_v8, %v3329_v49  ;;  %v1785_v18 = vrot.slane %v1756_v13, %v3208_v40  ;;  %v1778_v0 = vcombine.high %v1756_v13, %v1756_v13 }
  0xf4   : > { %vm1588_vm8 = vcmp.gt.f32.partialorder %v1567_v52, 0.5  ;;  %v1577_v5 = vcombine.high %v1567_v52, %v1567_v52  ;;  %v1789_v16 = vrot.slane %v3344_v61, %v3208_v40  ;;  %v1622_v20 = vrot.slane %v1611_v6, %v3208_v40 }
  0xf5   : > { %v1612_v60 = vsel %vm1588_vm8, 1, %v3016_v59  ;;  %vm1589_vm13 = vcmp.gt.f32.partialorder %v1575_v11, 0.5  ;;  %vm1592_vm4 = vcmp.gt.f32.partialorder %v1574_v9, 0.5  ;;  %vm3367_vm5 = vcmp.eq.s32.totalorder %v1682_v53, %v1785_v18 }
  0xf6   : > { %v1626_v62 = vrot.slane %v1612_v60, %v3208_v40  ;;  %vm1590_vm12 = vcmp.gt.f32.partialorder %v1577_v5, 0.5  ;;  %vm1815_vm15 = vcmp.eq.s32.totalorder %v1689_v58, %v1789_v16  ;;  %vm1651_vm3 = vcmp.eq.s32.totalorder %v1622_v20, 1 }
  0xf7   : > { %v1614_v19 = vsel %vm1590_vm12, 1, %v3016_v59  ;;  %v1613_v14 = vsel %vm1589_vm13, 1, %v3016_v59  ;;  %vm1659_vm8 = vmand %vm1520_vm2, %vm1651_vm3  ;;  %v1780_v25 = vcombine.high %v3344_v61, %v3344_v61  ;;  %vm1591_vm9 = vcmp.gt.f32.partialorder %v1560_v30, 0.5 }
  0xf8   : > { %vm1652_vm11 = vcmp.eq.s32.totalorder %v1626_v62, 1  ;;  %v1634_v39 = vrot.slane %v1614_v19, %v3208_v40  ;;  %v1630_v31 = vrot.slane %v1613_v14, %v3208_v40  ;;  %v1616_v48 = vsel %vm1592_vm4, 1, %v3016_v59 }
  0xf9   : > { %vm1660_vm14 = vmand %vm1521_vm10, %vm1652_vm11  ;;  %v1578_v2 = vcombine.high %v1574_v9, %v1574_v9  ;;  %vm1523_vm10 = vcmp.gt.f32.partialorder %v3341_v3, 0.5  ;;  %v1793_v50 = vrot.slane %v1778_v0, %v3208_v40  ;;  %v1777_v28 = vrot.slane %v1749_v41, %v3329_v49  ;;  %v1512_v0 = vpop.permute.xlu1 %1511 }
  0xfa   : > { %vm1654_vm11 = vcmp.eq.s32.totalorder %v1634_v39, 1  ;;  %vm1522_vm12 = vcmp.gt.f32.partialorder %v3347_v63, 0.5  ;;  %v1615_v17 = vsel %vm1591_vm9, 1, %v3016_v59  ;;  %v1642_v51 = vrot.slane %v1616_v48, %v3208_v40 }
  0xfb   : > { %v1797_v52 = vrot.slane %v1780_v25, %v3208_v40  ;;  %vm1653_vm13 = vcmp.eq.s32.totalorder %v1630_v31, 1  ;;  %v1576_v55 = vcombine.high %v1560_v30, %v1560_v30  ;;  %v1763_v57 = vrot.slane %v1747_v24, %v3329_v49 }
  0xfc   : > { %vm1816_vm2 = vcmp.eq.s32.totalorder %v3357_v23, %v1793_v50  ;;  %v1805_v60 = vrot.slane %v1777_v28, %v3208_v40  ;;  %v1638_v61 = vrot.slane %v1615_v17, %v3208_v40  ;;  %vm1661_vm3 = vmand %vm1522_vm12, %vm1653_vm13  ;;  %vm1525_vm4 = vcmp.gt.f32.partialorder %v1505_v35, 0.5  ;;  %v1519_v23 = vpop.permute.xlu0 %1518 }
  0xfd   : > { %vm1593_vm9 = vcmp.gt.f32.partialorder %v1576_v55, 0.5  ;;  %v1801_v13 = vrot.slane %v1763_v57, %v3208_v40  ;;  %v1779_v41 = vcombine.high %v1763_v57, %v1763_v57 }
  0xfe   : > { %vm1655_vm12 = vcmp.eq.s32.totalorder %v1638_v61, 1  ;;  %v1617_v14 = vsel %vm1593_vm9, 1, %v3016_v59 }
  0xff   : > { %v1646_v42 = vrot.slane %v1617_v14, %v3208_v40 }
 0x1a6   : > { %v1187_v29 = vpop.f32.mrb[0].mxu1 }
 0x1a7   : > { %v1668_v32 = vsel %vm1660_vm14, %v1187_v29, -1e+30  ;;  %v2776_v33 = vpop.f32.mrb[1].mxu1  ;;  %vm1594_vm14 = vcmp.gt.f32.partialorder %v1578_v2, 0.5  ;;  %v1781_v29 = vcombine.high %v1777_v28, %v1777_v28 }
 0x1a8   : > { %v3364_v34 = vsel %vm1815_vm15, -50000.0, %v1668_v32  ;;  %v1190_v21 = vpop.f32.mrb[2].mxu1  ;;  %vm3394_vm15 = vmand %vm1523_vm10, %vm1654_vm11  ;;  %v1618_v49 = vsel %vm1594_vm14, 1, %v3016_v59  ;;  %vm1524_vm10 = vcmp.gt.f32.partialorder %v1498_v47, 0.5  ;;  %vm3419_vm11 = vcmp.eq.s32.totalorder %v1717_v54, %v1805_v60 }
 0x1a9   : > { %v1833_v43 = vsel %vm827_vm0, %v3364_v34, -inf  ;;  %v2777_v45 = vpop.f32.mrb[3].mxu1  ;;  %v1650_v19 = vrot.slane %v1618_v49, %v3208_v40  ;;  %vm3436_vm14 = vcmp.eq.s32.totalorder %v1710_v4, %v1801_v13  ;;  %v1813_v25 = vrot.slane %v1781_v29, %v3208_v40 }
 0x1aa   : > { %v1142_v1 = vpop.f32.mrb[0].mxu0  ;;  %1834 = vmax.xlane.f32.xlu0 %v1833_v43 }
 0x1ab   : > { %v1667_v7 = vsel %vm1659_vm8, %v1142_v1, -1e+30  ;;  %v2770_v46 = vpop.f32.mrb[1].mxu0  ;;  %vm1817_vm8 = vcmp.eq.s32.totalorder %v3354_v22, %v1797_v52 }
 0x1ac   : > { %v1145_v10 = vpop.f32.mrb[2].mxu0  ;;  %v3382_v15 = vsel %vm3367_vm5, -50000.0, %v1667_v7  ;;  %vm3404_vm5 = vcmp.eq.s32.totalorder %v1642_v51, 1  ;;  %v1731_v46 = vpop.permute.xlu0 %1730 }
 0x1ad   : > { %v2771_v27 = vpop.f32.mrb[3].mxu0  ;;  %v1830_v26 = vsel %vm827_vm0, %v3382_v15, -inf  ;;  %vm3426_vm13 = vmand %vm1525_vm4, %vm3404_vm5  ;;  %vm1526_vm4 = vcmp.gt.f32.partialorder %v1512_v0, 0.5  ;;  %vm1821_vm9 = vcmp.eq.s32.totalorder %v1731_v46, %v1813_v25 }
 0x1ae   : > { %1831 = vmax.xlane.f32.xlu1 %v1830_v26  ;;  %v1277_v53 = vpop.f32.mrb[4].mxu1  ;;  %v1809_v27 = vrot.slane %v1779_v41, %v3208_v40  ;;  %v1724_v26 = vpop.permute.xlu1 %1723 }
 0x1af   : > { %v2788_v56 = vpop.f32.mrb[5].mxu1  ;;  %v1670_v8 = vsel %vm3394_vm15, %v1277_v53, -1e+30  ;;  %vm3440_vm15 = vmand %vm1524_vm10, %vm1655_vm12  ;;  %vm1953_vm12 = vcmask 1043456  }
 0x1b0   : > { %v1280_v58 = vpop.f32.mrb[6].mxu1  ;;  %v3432_v18 = vsel %vm1817_vm8, -50000.0, %v1670_v8  ;;  %vm1657_vm8 = vcmp.eq.s32.totalorder %v1646_v42, 1  ;;  %v3017_v42 = vmov 1983009808  }
 0x1b1   : > { %v2789_v3 = vpop.f32.mrb[7].mxu1  ;;  %v1839_v35 = vsel %vm827_vm0, %v3432_v18, -inf  ;;  %vm1665_vm10 = vmand %vm1526_vm4, %vm1657_vm8  ;;  %vm2455_vm4 = vcmask 31744   ;;  %vm2396_vm8 = vcmask 261120  }
 0x1b2   : > { %v1232_v62 = vpop.f32.mrb[4].mxu0 }
 0x1b3   : > { %v1669_v6 = vsel %vm1661_vm3, %v1232_v62, -1e+30  ;;  %v2782_v11 = vpop.f32.mrb[5].mxu0  ;;  %vm1658_vm3 = vcmp.eq.s32.totalorder %v1650_v19, 1 }
 0x1b4   : > { %v1235_v12 = vpop.f32.mrb[6].mxu0  ;;  %v3414_v63 = vsel %vm1816_vm2, -50000.0, %v1669_v6  ;;  %vm1527_vm2 = vcmp.gt.f32.partialorder %v1519_v23, 0.5 }
 0x1b5   : > { %v2783_v16 = vpop.f32.mrb[7].mxu0  ;;  %v1836_v20 = vsel %vm827_vm0, %v3414_v63, -inf  ;;  %vm1666_vm5 = vmand %vm1527_vm2, %vm1658_vm3  ;;  %vm2450_vm2 = vcmask 1046534   ;;  %vm2452_vm3 = vcmask 1047559  }
 0x1b6   : > { %1837 = vmax.xlane.f32.xlu0 %v1836_v20  ;;  %v1367_v30 = vpop.f32.mrb[8].mxu1 }
 0x1b7   : > { %v1672_v21 = vsel %vm3426_vm13, %v1367_v30, -1e+30  ;;  %v2800_v22 = vpop.f32.mrb[9].mxu1  ;;  %vm2444_vm13 = vcmask 1043459  }
 0x1b8   : > { %v1370_v39 = vpop.f32.mrb[10].mxu1  ;;  %v3450_v59 = vsel %vm3419_vm11, -50000.0, %v1672_v21  ;;  %vm1820_vm11 = vcmp.eq.s32.totalorder %v1724_v26, %v1809_v27  ;;  %v802_v26 = vld [vmem:[%s3521_s22 + $0x2] sm:$0x3] }
 0x1b9   : > { %v2801_v43 = vpop.f32.mrb[11].mxu1  ;;  %v1845_v7 = vsel %vm827_vm0, %v3450_v59, -inf }
 0x1ba   : > { %v1322_v1 = vpop.f32.mrb[8].mxu0  ;;  %1840 = vmax.xlane.f32.xlu0 %v1839_v35 }
 0x1bb   : > { %v1671_v45 = vsel %vm3440_vm15, %v1322_v1, -1e+30  ;;  %v2794_v31 = vpop.f32.mrb[9].mxu0  ;;  %v1016_v1 = vunpack.c.l.s4 %v3017_v42  ;;  %v808_v42 = vld [vmem:[%s3521_s22 + $0xe] sm:$0x3]  ;;  %vm2448_vm15 = vcmask 1045509  }
 0x1bc   : > { %v1826_v47 = vsel %vm3436_vm14, -50000.0, %v1671_v45  ;;  %v1325_v48 = vpop.f32.mrb[10].mxu0  ;;  %vm2446_vm14 = vcmask 1044484  }
 0x1bd   : > { %v1842_v2 = vsel %vm827_vm0, %v1826_v47, -inf  ;;  %v2795_v10 = vpop.f32.mrb[11].mxu0  ;;  %v1017_v31 = vunpack.c.0.s8 %v1016_v1 }
 0x1be   : > { %1843 = vmax.xlane.f32.xlu1 %v1842_v2  ;;  %1846 = vmax.xlane.f32.xlu0 %v1845_v7  ;;  %v1457_v50 = vpop.f32.mrb[12].mxu1  ;;  %v801_v7 = vld [vmem:[%s3521_s22] sm:$0x3] }
 0x1bf   : > { %v1674_v28 = vsel %vm1666_vm5, %v1457_v50, -1e+30  ;;  %v2812_v17 = vpop.f32.mrb[13].mxu1  ;;  %v3525_v46 = vsub.s32 %v1017_v31, %v3201_v38  ;;  %v2895_v2 = vld [vmem:[%s3117_s23] ss:$0 sps:$4 sm:$0x33]  }
 0x1c0   : > { %v1829_v51 = vsel %vm1821_vm9, -50000.0, %v1674_v28  ;;  %v1460_v52 = vpop.f32.mrb[14].mxu1  ;;  %vm2394_vm5 = vcmask 195584  }
 0x1c1   : > { %v1851_v54 = vsel %vm827_vm0, %v1829_v51, -inf  ;;  %v2813_v55 = vpop.f32.mrb[15].mxu1  ;;  %v1021_v52 = vrot.slane %v2895_v2, %v3525_v46 }
 0x1c2   : > { %v1412_v53 = vpop.f32.mrb[12].mxu0  ;;  %1852 = vmax.xlane.f32.xlu0 %v1851_v54  ;;  %v1030_v55 = vcombine.low %v802_v26, %v802_v26 }
 0x1c3   : > { %v1673_v44 = vsel %vm1665_vm10, %v1412_v53, -1e+30  ;;  %v2806_v56 = vpop.f32.mrb[13].mxu0  ;;  %v1080_v53 = vsel %vm981_vm6, %v801_v7, %v1021_v52 }
 0x1c4   : > { %v1828_v40 = vsel %vm1820_vm11, -50000.0, %v1673_v44  ;;  %v1415_v57 = vpop.f32.mrb[14].mxu0  ;;  %v1954_v54 = vsel %vm1953_vm12, %v1080_v53, 0  ;;  %v1037_v44 = vrot.slane %v1030_v55, %v3525_v46  ;;  %v803_v56 = vld [vmem:[%s3521_s22 + $0x4] sm:$0x3] }
 0x1c5   : > { %v1848_v58 = vsel %vm827_vm0, %v1828_v40, -inf  ;;  %v2807_v60 = vpop.f32.mrb[15].mxu0  ;;  %2815 = vmatpush3.bf16.msra.mxu0 %v1954_v54 }
 0x1c6   : > { %1849 = vmax.xlane.f32.xlu1 %v1848_v58  ;;  %2826 = vmatprep.subr.bf16.mxu0 %v3013_v36  ;;  %v1086_v57 = vsel %vm981_vm6, %v803_v56, %v1037_v44 }
 0x1c7   : > { %v2044_v58 = vsel %vm1953_vm12, %v1086_v57, 0 }
 0x237   : > { %v3464_v4 = vpop.xlane.xlu0 %1834 }
 0x238   : > { %v1855_v61 = vsub.f32 %v3364_v34, %v3464_v4 }
 0x23a   : > { %v1864_v62 = vmul.f32 1.442695, %v1855_v61  ;;  %v804_v61 = vld [vmem:[%s3521_s22 + $0x6] sm:$0x3] }
 0x23b   : > { %v3468_v3 = vpop.xlane.xlu1 %1831 }
 0x23c   : > { %v1854_v5 = vsub.f32 %v3382_v15, %v3468_v3  ;;  %2941 = vpow2.f32 %v1864_v62  ;;  %v1046_v62 = vcombine.low %v804_v61, %v804_v61 }
 0x23e   : > { %v1862_v49 = vmul.f32 1.442695, %v1854_v5 }
 0x240   : > { %2943 = vpow2.f32 %v1862_v49 }
 0x243   : > { %v3472_v6 = vpop.xlane.xlu0 %1837 }
 0x244   : > { %v1856_v11 = vsub.f32 %v3414_v63, %v3472_v6 }
 0x246   : > { %v1866_v8 = vmul.f32 1.442695, %v1856_v11  ;;  %v3476_v12 = vpop.eup %2941  ;;  %v1053_v11 = vrot.slane %v1046_v62, %v3525_v46 }
 0x247   : > { %v3478_v13 = vpop.xlane.xlu0 %1840  ;;  %v1881_v15 = vsel %vm827_vm0, %v3476_v12, 0.0 }
 0x248   : > { %2945 = vpow2.f32 %v1866_v8  ;;  %v1857_v34 = vsub.f32 %v3432_v18, %v3478_v13  ;;  %1882 = vadd.xlane.f32.xlu0 %v1881_v15  ;;  %v805_v8 = vld [vmem:[%s3521_s22 + $0x8] sm:$0x3] }
 0x249   : > { %v1092_v15 = vsel %vm981_vm6, %v805_v8, %v1053_v11 }
 0x24a   : > { %v3484_v16 = vpop.eup %2943  ;;  %v1868_v20 = vmul.f32 1.442695, %v1857_v34  ;;  %v1054_v34 = vcombine.low %v805_v8, %v805_v8 }
 0x24b   : > { %v3486_v9 = vpop.xlane.xlu1 %1843  ;;  %v3488_v24 = vpop.xlane.xlu0 %1846  ;;  %v1878_v63 = vsel %vm827_vm0, %v3484_v16, 0.0 }
 0x24c   : > { %2947 = vpow2.f32 %v1868_v20  ;;  %v1858_v23 = vsub.f32 %v1826_v47, %v3486_v9  ;;  %v1859_v18 = vsub.f32 %v3450_v59, %v3488_v24  ;;  %1879 = vadd.xlane.f32.xlu1 %v1878_v63  ;;  %v1022_v47 = vcombine.low %v801_v7, %v801_v7 }
 0x24d   : > { %v3557_v20 = vsel %vm1953_vm12, %v1092_v15, 0  ;;  %v1061_v63 = vrot.slane %v1054_v34, %v3525_v46 }
 0x24e   : > { %v1870_v19 = vmul.f32 1.442695, %v1858_v23  ;;  %v1872_v29 = vmul.f32 1.442695, %v1859_v18  ;;  %v1029_v27 = vrot.slane %v1022_v47, %v3525_v46  ;;  %v806_v23 = vld [vmem:[%s3521_s22 + $0xa] sm:$0x3] }
 0x24f   : > { %v3495_v14 = vpop.xlane.xlu0 %1852  ;;  %v1062_v18 = vcombine.low %v806_v23, %v806_v23 }
 0x250   : > { %2949 = vpow2.f32 %v1870_v19  ;;  %v1861_v30 = vsub.f32 %v1829_v51, %v3495_v14  ;;  %v1083_v28 = vsel %vm981_vm6, %v802_v26, %v1029_v27  ;;  %v1095_v19 = vsel %vm981_vm6, %v806_v23, %v1061_v63 }
 0x251   : > { %2951 = vpow2.f32 %v1872_v29  ;;  %v1999_v51 = vsel %vm1953_vm12, %v1083_v28, 0  ;;  %v3563_v29 = vsel %vm1953_vm12, %v1095_v19, 0 }
 0x252   : > { %v3498_v32 = vpop.eup %2945  ;;  %v1876_v33 = vmul.f32 1.442695, %v1861_v30  ;;  %2821 = vmatpush3.bf16.msra.mxu1 %v1999_v51  ;;  %v1069_v30 = vrot.slane %v1062_v18, %v3525_v46 }
 0x253   : > { %v3500_v21 = vpop.xlane.xlu1 %1849  ;;  %v1884_v22 = vsel %vm827_vm0, %v3498_v32, 0.0  ;;  %2832 = vmatprep.subr.bf16.mxu1 %v3013_v36 }
 0x254   : > { %v1860_v0 = vsub.f32 %v1828_v40, %v3500_v21  ;;  %1885 = vadd.xlane.f32.xlu1 %v1884_v22  ;;  %2953 = vpow2.f32 %v1876_v33  ;;  %v1038_v40 = vcombine.low %v803_v56, %v803_v56  ;;  %v807_v33 = vld [vmem:[%s3521_s22 + $0xc] sm:$0x3] }
 0x255   : > { %v1070_v22 = vcombine.low %v807_v33, %v807_v33 }
 0x256   : > { %v3505_v35 = vpop.eup %2947  ;;  %v1874_v39 = vmul.f32 1.442695, %v1860_v0  ;;  %v1045_v60 = vrot.slane %v1038_v40, %v3525_v46  ;;  %v1098_v0 = vsel %vm981_vm6, %v807_v33, %v1069_v30 }
 0x257   : > { %v1887_v59 = vsel %vm827_vm0, %v3505_v35, 0.0 }
 0x258   : > { %2955 = vpow2.f32 %v1874_v39  ;;  %1888 = vadd.xlane.f32.xlu0 %v1887_v59  ;;  %v1089_v5 = vsel %vm981_vm6, %v804_v61, %v1045_v60  ;;  %v3569_v39 = vsel %vm1953_vm12, %v1098_v0, 0  ;;  %v1077_v59 = vrot.slane %v1070_v22, %v3525_v46 }
 0x259   : > { %v2089_v49 = vsel %vm1953_vm12, %v1089_v5, 0 }
 0x25a   : > { %v3509_v41 = vpop.eup %2949  ;;  %v1101_v1 = vsel %vm981_vm6, %v808_v42, %v1077_v59  ;;  %vm2442_vm6 = vcmask 1042434  }
 0x25b   : > { %v3511_v43 = vpop.eup %2951  ;;  %v1890_v25 = vsel %vm827_vm0, %v3509_v41, 0.0 }
 0x25c   : > { %1891 = vadd.xlane.f32.xlu1 %v1890_v25  ;;  %v1893_v45 = vsel %vm827_vm0, %v3511_v43, 0.0  ;;  %v3575_v25 = vsel %vm1953_vm12, %v1101_v1, 0 }
 0x25d   : > { %1894 = vadd.xlane.f32.xlu0 %v1893_v45 }
 0x25e   : > { %v3527_v48 = vpop.eup %2953 }
 0x25f   : > { %v1899_v10 = vsel %vm827_vm0, %v3527_v48, 0.0 }
 0x261   : > { %1900 = vadd.xlane.f32.xlu0 %v1899_v10 }
 0x262   : > { %v3534_v50 = vpop.eup %2955 }
 0x263   : > { %v1896_v17 = vsel %vm827_vm0, %v3534_v50, 0.0  ;;  %vm2440_vm0 = vcmask 1041409  }
 0x264   : > { %1897 = vadd.xlane.f32.xlu1 %v1896_v17 }
 0x2d5   : > { %v1883_v45 = vpop.xlane.xlu0 %1882 }
 0x2d6   : > { %2957 = vrcp.f32 %v1883_v45 }
 0x2d9   : > { %v1880_v31 = vpop.xlane.xlu1 %1879 }
 0x2da   : > { %2959 = vrcp.f32 %v1880_v31 }
 0x2db   : > { %2961 = vlog2.f32 %v1880_v31 }
 0x2e0   : > { %v2958_v47 = vpop.eup %2957 }
 0x2e1   : > { %v1886_v7 = vpop.xlane.xlu1 %1885  ;;  %v1935_v2 = vmul.f32 %v2958_v47, %v3476_v12 }
 0x2e2   : > { %2963 = vrcp.f32 %v1886_v7 }
 0x2e3   : > { %2965 = vlog2.f32 %v1886_v7  ;;  %v1943_v27 = vpack.c.bf16 %v1935_v2, %v1935_v2 }
 0x2e4   : > { %v2960_v10 = vpop.eup %2959  ;;  %2967 = vlog2.f32 %v1883_v45 }
 0x2e5   : > { %v1889_v26 = vpop.xlane.xlu0 %1888  ;;  %v1934_v28 = vmul.f32 %v2960_v10, %v3484_v16  ;;  %2823 = vmatmul.mubr.msk.bf16.vlgmr.msra.gmra.mrb[16].mxu1 %vm1102_vm7, %v1943_v27  ;;  %v2962_v16 = vpop.eup %2961 }
 0x2e6   : > { %2969 = vlog2.f32 %v1889_v26  ;;  %2833 = vmatpush3.bf16.msra.mxu1 %v2089_v49  ;;  %2834 = vmatprep.mubr.msk.bf16.mxu1 %vm3014_vm1, %v3013_v36  ;;  %v1903_v40 = vmul.f32 0.6931472, %v2962_v16 }
 0x2e7   : > { %2971 = vrcp.f32 %v1889_v26  ;;  %v1942_v17 = vpack.c.bf16 %v1934_v28, %v1934_v28  ;;  %2844 = vmatprep.subr.bf16.mxu1 %v3013_v36 }
 0x2e8   : > { %v1918_v8 = vadd.f32 %v1903_v40, %v3468_v3 }
 0x2e9   : > { %v1892_v51 = vpop.xlane.xlu1 %1891  ;;  %2817 = vmatmul.mubr.msk.bf16.vlgmr.msra.gmra.mrb[16].mxu0 %vm1102_vm7, %v1942_v17 }
 0x2ea   : > { %2973 = vlog2.f32 %v1892_v51  ;;  %v1895_v12 = vpop.xlane.xlu0 %1894  ;;  %2827 = vmatpush3.bf16.msra.mxu0 %v2044_v58  ;;  %2828 = vmatprep.mubr.msk.bf16.mxu0 %vm3014_vm1, %v3013_v36  ;;  %v2407_v58 = vand.u32 127, %v1018_v37 }
 0x2eb   : > { %2975 = vrcp.f32 %v1892_v51  ;;  %2838 = vmatprep.subr.bf16.mxu0 %v3013_v36 }
 0x2ec   : > { %2977 = vlog2.f32 %v1895_v12  ;;  %v2964_v52 = vpop.eup %2963  ;;  %v2410_v18 = vsub.s32 %v2407_v58, %v3201_v38 }
 0x2ed   : > { %2979 = vrcp.f32 %v1895_v12  ;;  %v2966_v53 = vpop.eup %2965  ;;  %v1936_v55 = vmul.f32 %v2964_v52, %v3498_v32 }
 0x2ee   : > { %v1901_v54 = vpop.xlane.xlu0 %1900  ;;  %v2968_v44 = vpop.eup %2967  ;;  %v1907_v61 = vmul.f32 0.6931472, %v2966_v53 }
 0x2ef   : > { %2981 = vlog2.f32 %v1901_v54  ;;  %v1944_v57 = vpack.c.bf16 %v1936_v55, %v1936_v55  ;;  %v1905_v5 = vmul.f32 0.6931472, %v2968_v44 }
 0x2f0   : > { %v2970_v56 = vpop.eup %2969  ;;  %2983 = vrcp.f32 %v1901_v54  ;;  %v1920_v15 = vadd.f32 %v1907_v61, %v3472_v6  ;;  %v2411_v6 = vrot.slane %v1918_v8, %v2410_v18 }
 0x2f1   : > { %v2972_v60 = vpop.eup %2971  ;;  %v1898_v62 = vpop.xlane.xlu1 %1897  ;;  %v1909_v49 = vmul.f32 0.6931472, %v2970_v56  ;;  %2829 = vmatmul.mubr.msk.bf16.vlgmr.msra.gmra.mrb[20].mxu0 %vm1102_vm7, %v1944_v57 }
 0x2f2   : > { %2985 = vlog2.f32 %v1898_v62  ;;  %v1937_v11 = vmul.f32 %v2972_v60, %v3505_v35  ;;  %2839 = vmatpush3.bf16.msra.mxu0 %v3557_v20  ;;  %2840 = vmatprep.mubr.msk.bf16.mxu0 %vm3014_vm1, %v3013_v36  ;;  %v1919_v35 = vadd.f32 %v1905_v5, %v3464_v4 }
 0x2f3   : > { %2987 = vrcp.f32 %v1898_v62  ;;  %2850 = vmatprep.subr.bf16.mxu0 %v3013_v36  ;;  %v1921_v20 = vadd.f32 %v1909_v49, %v3478_v13  ;;  %v2419_v13 = vrot.slane %v1920_v15, %v2410_v18 }
 0x2f4   : > { %v2974_v32 = vpop.eup %2973  ;;  %v1945_v37 = vpack.c.bf16 %v1937_v11, %v1937_v11 }
 0x2f5   : > { %v2976_v34 = vpop.eup %2975  ;;  %v1911_v63 = vmul.f32 0.6931472, %v2974_v32  ;;  %v2423_v59 = vrot.slane %v1921_v20, %v2410_v18 }
 0x2f6   : > { %v2978_v23 = vpop.eup %2977  ;;  %2835 = vmatmul.mubr.msk.bf16.vlgmr.msra.gmra.mrb[20].mxu1 %vm1102_vm7, %v1945_v37  ;;  %v1938_v19 = vmul.f32 %v2976_v34, %v3509_v41  ;;  %v2415_v41 = vrot.slane %v1919_v35, %v2410_v18 }
 0x2f7   : > { %v2980_v30 = vpop.eup %2979  ;;  %v1922_v3 = vadd.f32 %v1911_v63, %v3486_v9  ;;  %v1913_v33 = vmul.f32 0.6931472, %v2978_v23  ;;  %2845 = vmatpush3.bf16.msra.mxu1 %v3563_v29  ;;  %2846 = vmatprep.mubr.msk.bf16.mxu1 %vm3014_vm1, %v3013_v36 }
 0x2f8   : > { %v1946_v22 = vpack.c.bf16 %v1938_v19, %v1938_v19  ;;  %v1939_v0 = vmul.f32 %v2980_v30, %v3511_v43  ;;  %2856 = vmatprep.subr.bf16.mxu1 %v3013_v36  ;;  %v2441_v45 = vsel %vm2440_vm0, %v2415_v41, %v2411_v6 }
 0x2f9   : > { %v2982_v4 = vpop.eup %2981  ;;  %v1923_v9 = vadd.f32 %v1913_v33, %v3488_v24  ;;  %v2427_v1 = vrot.slane %v1922_v3, %v2410_v18  ;;  %v2443_v47 = vsel %vm2442_vm6, %v2419_v13, %v2441_v45  ;;  %v3018_v33 = vmov 1934713408  }
 0x2fa   : > { %v1917_v42 = vmul.f32 0.6931472, %v2982_v4  ;;  %2841 = vmatmul.mubr.msk.bf16.vlgmr.msra.gmra.mrb[24].mxu0 %vm1102_vm7, %v1946_v22  ;;  %v2984_v29 = vpop.eup %2983  ;;  %v1947_v31 = vpack.c.bf16 %v1939_v0, %v1939_v0  ;;  %v2445_v24 = vsel %vm2444_vm13, %v2423_v59, %v2443_v47  ;;  %v2346_v6 = vunpack.c.l.s4 %v3018_v33 }
 0x2fb   : > { %2851 = vmatpush3.bf16.msra.mxu0 %v3569_v39  ;;  %2852 = vmatprep.mubr.msk.bf16.mxu0 %vm3014_vm1, %v3013_v36  ;;  %v2431_v10 = vrot.slane %v1923_v9, %v2410_v18  ;;  %v2447_v26 = vsel %vm2446_vm14, %v2427_v1, %v2445_v24  ;;  %v1941_v51 = vmul.f32 %v2984_v29, %v3527_v48 }
 0x2fc   : > { %v2986_v43 = vpop.eup %2985  ;;  %v1925_v27 = vadd.f32 %v1917_v42, %v3495_v14  ;;  %v2347_v59 = vunpack.c.0.s8 %v2346_v6 }
 0x2fd   : > { %v2988_v7 = vpop.eup %2987  ;;  %v1915_v2 = vmul.f32 0.6931472, %v2986_v43  ;;  %v2449_v14 = vsel %vm2448_vm15, %v2431_v10, %v2447_v26 }
 0x2fe   : > { %2847 = vmatmul.mubr.msk.bf16.vlgmr.msra.gmra.mrb[24].mxu1 %vm1102_vm7, %v1947_v31  ;;  %v1940_v39 = vmul.f32 %v2988_v7, %v3534_v50  ;;  %v2439_v16 = vrot.slane %v1925_v27, %v2410_v18  ;;  %v2350_v7 = vsub.s32 %v2347_v59, %v3201_v38 }
 0x2ff   : > { %v1924_v28 = vadd.f32 %v1915_v2, %v3500_v21  ;;  %2857 = vmatpush3.bf16.msra.mxu1 %v3575_v25  ;;  %2858 = vmatprep.mubr.msk.bf16.mxu1 %vm3014_vm1, %v3013_v36  ;;  %v1949_v25 = vpack.c.bf16 %v1941_v51, %v1941_v51  ;;  %vm2392_vm1 = vcmask 130048  }
 0x300   : > { %v1948_v17 = vpack.c.bf16 %v1940_v39, %v1940_v39 }
 0x301   : > { %v2435_v12 = vrot.slane %v1924_v28, %v2410_v18 }
 0x302   : > { %2853 = vmatmul.mubr.msk.bf16.vlgmr.msra.gmra.mrb[28].mxu0 %vm1102_vm7, %v1948_v17 }
 0x303   : > { %v2451_v21 = vsel %vm2450_vm2, %v2435_v12, %v2449_v14 }
 0x304   : > { %v2453_v50 = vsel %vm2452_vm3, %v2439_v16, %v2451_v21 }
 0x305   : > { %2456 = vst.msk [vmem:[%s791_s25] sm:$0xff] %vm2455_vm4, %v2453_v50 }
 0x306   : > { %2859 = vmatmul.mubr.msk.bf16.vlgmr.msra.gmra.mrb[28].mxu1 %vm1102_vm7, %v1949_v25 }
 0x3b8   : > { %v2035_v36 = vpop.f32.mrb[16].mxu1 }
 0x3b9   : > { %v2824_v52 = vpop.f32.mrb[17].mxu1 }
 0x3ba   : > { %v2038_v48 = vpop.f32.mrb[18].mxu1 }
 0x3bb   : > { %v2825_v53 = vpop.f32.mrb[19].mxu1 }
 0x3bc   : > { %v1990_v54 = vpop.f32.mrb[16].mxu0 }
 0x3bd   : > { %v2818_v55 = vpop.f32.mrb[17].mxu0 }
 0x3be   : > { %v1993_v44 = vpop.f32.mrb[18].mxu0 }
 0x3bf   : > { %v2819_v56 = vpop.f32.mrb[19].mxu0 }
 0x3c4   : > { %v2080_v40 = vpop.f32.mrb[20].mxu0 }
 0x3c5   : > { %v2311_v57 = vcombine.low %v1990_v54, %v2080_v40  ;;  %v2830_v60 = vpop.f32.mrb[21].mxu0 }
 0x3c6   : > { %v2083_v58 = vpop.f32.mrb[22].mxu0 }
 0x3c7   : > { %v2831_v61 = vpop.f32.mrb[23].mxu0  ;;  %v2318_v32 = vrot.slane %v2311_v57, %v3525_v46 }
 0x3c9   : > { %v2125_v62 = vpop.f32.mrb[20].mxu1 }
 0x3ca   : > { %v2319_v5 = vcombine.low %v2035_v36, %v2125_v62  ;;  %v2836_v49 = vpop.f32.mrb[21].mxu1 }
 0x3cb   : > { %v2128_v11 = vpop.f32.mrb[22].mxu1 }
 0x3cc   : > { %v2326_v8 = vrot.slane %v2319_v5, %v3525_v46  ;;  %v2837_v37 = vpop.f32.mrb[23].mxu1 }
 0x3cd   : > { %v2170_v34 = vpop.f32.mrb[24].mxu0 }
 0x3ce   : > { %v2343_v15 = vcombine.low %v2318_v32, %v2326_v8  ;;  %v2344_v63 = vcombine.high %v2318_v32, %v2326_v8  ;;  %v2842_v23 = vpop.f32.mrb[25].mxu0 }
 0x3cf   : > { %v2173_v18 = vpop.f32.mrb[26].mxu0 }
 0x3d0   : > { %v2843_v35 = vpop.f32.mrb[27].mxu0  ;;  %v2358_v24 = vrot.slane %v2344_v63, %v2350_v7  ;;  %v2351_v27 = vrot.slane %v2343_v15, %v2350_v7 }
 0x3d1   : > { %v2215_v20 = vpop.f32.mrb[24].mxu1 }
 0x3d2   : > { %v2848_v19 = vpop.f32.mrb[25].mxu1 }
 0x3d3   : > { %v2218_v30 = vpop.f32.mrb[26].mxu1 }
 0x3d4   : > { %v2849_v3 = vpop.f32.mrb[27].mxu1 }
 0x3d5   : > { %v2260_v22 = vpop.f32.mrb[28].mxu0 }
 0x3d6   : > { %v2327_v0 = vcombine.low %v2170_v34, %v2260_v22  ;;  %v2854_v4 = vpop.f32.mrb[29].mxu0 }
 0x3d7   : > { %v2263_v13 = vpop.f32.mrb[30].mxu0 }
 0x3d8   : > { %v2855_v41 = vpop.f32.mrb[31].mxu0  ;;  %v2334_v43 = vrot.slane %v2327_v0, %v3525_v46 }
 0x3d9   : > { %v2305_v9 = vpop.f32.mrb[28].mxu1 }
 0x3da   : > { %v2335_v42 = vcombine.low %v2215_v20, %v2305_v9  ;;  %v2860_v29 = vpop.f32.mrb[29].mxu1 }
 0x3db   : > { %v2308_v1 = vpop.f32.mrb[30].mxu1 }
 0x3dc   : > { %v2342_v45 = vrot.slane %v2335_v42, %v3525_v46  ;;  %v2861_v31 = vpop.f32.mrb[31].mxu1 }
 0x3de   : > { %v2359_v47 = vcombine.low %v2334_v43, %v2342_v45  ;;  %v2360_v2 = vcombine.high %v2334_v43, %v2342_v45 }
 0x3e0   : > { %v2374_v10 = vrot.slane %v2360_v2, %v2350_v7  ;;  %v2367_v39 = vrot.slane %v2359_v47, %v2350_v7 }
 0x3e2   : > { %v2377_v26 = vcombine.low %v2358_v24, %v2374_v10  ;;  %v2376_v28 = vcombine.high %v2351_v27, %v2367_v39  ;;  %v2378_v17 = vcombine.high %v2358_v24, %v2374_v10  ;;  %v2375_v51 = vcombine.low %v2351_v27, %v2367_v39 }
 0x3e4   : > { %2384 = vrot.lane.b32.xlu0 %v2377_v26, %s3019_s26  ;;  %2380 = vrot.lane.b32.xlu1 %v2376_v28, %s3020_s27 }
 0x3e8   : > { %2388 = vrot.lane.b32.xlu1 %v2378_v17, %s3021_s28 }
 0x456   : > { %v2381_v46 = vpop.permute.xlu1 %2380  ;;  %v2385_v12 = vpop.permute.xlu0 %2384 }
 0x457   : > { %v2391_v38 = vsel %vm1102_vm7, %v2375_v51, %v2381_v46 }
 0x458   : > { %v2393_v16 = vsel %vm2392_vm1, %v2391_v38, %v2385_v12 }
 0x45a   : > { %v2389_v14 = vpop.permute.xlu1 %2388 }
 0x45b   : > { %v2395_v21 = vsel %vm2394_vm5, %v2393_v16, %v2389_v14 }
 0x45c   : > { %2397 = vst.msk [vmem:[%s784_s30] sm:$0xff] %vm2396_vm8, %v2395_v21 }
 0x45d PF: > { %s20_s11 = sadd.s32 1, %s3011_s11   ;;  %s3671_s30 = smov %s3007_s10 }
 0x45e   : > { %p17_p5 = scmp.ge.s32.totalorder %s20_s11, 10   ;;  %s3672_s10 = smov %s3674_s12 }
 0x460   :  { %19 = sbr.rel (!%p17_p5) target bundleno = 2 (0x2), region = 115 }

// kernel: reformer_encoder_layer.6
= control target key start
LH: loop header
LB: loop body
LE: loop exit
PB: predicated region body
PF: predicated region fallthrough
CT: control target
= control target key end

     0   :  { %vm55_vm0 = vcmask 261120   ;;  %s220_s1 = inlined_call_operand.vmem [shape: bf16[32,32], index: 1, kind: input, shape index: {}]   ;;  %s221_s0 = inlined_call_operand.vmem [shape: bf16[32,32], index: 0, kind: input, shape index: {}]   ;;  %s222_s2 = inlined_call_operand.vmem [shape: f32[1,32], index: 2, kind: input, shape index: {}]   ;;  %s223_s3 = inlined_call_operand.vmem [shape: f32[32,32], index: 3, kind: input, shape index: {}]   ;;  %s224_s4 = inlined_call_operand.vmem [shape: f32[32,32], index: 4, kind: output, shape index: {}]  }
   0x1   :  { %v146_v0 = vld [vmem:[%s220_s1] sm:$0xff]   ;;  %v147_v1 = vld [vmem:[%s220_s1 + $0x8] sm:$0xff]   ;;  %v113_v6 = vld [vmem:[%s223_s3 + $0x10] sm:$0xff] }
   0x2   :  { %138 = vmatprep.subr.bf16.mxu0 %v146_v0  ;;  %v148_v2 = vld [vmem:[%s221_s0] sm:$0xff]   ;;  %v149_v3 = vld [vmem:[%s221_s0 + $0x8] sm:$0xff]   ;;  %v114_v12 = vld [vmem:[%s223_s3 + $0x18] sm:$0xff] }
   0x3   :  { %139 = vmatpush3.bf16.msra.mxu0 %v146_v0  ;;  %142 = vmatprep.mubr.msk.bf16.mxu0 %vm55_vm0, %v148_v2  ;;  %v127_v4 = vld [vmem:[%s222_s2] ss:$0 sm:$0xff]  ;;  %v112_v16 = vld [vmem:[%s223_s3 + $0x8] sm:$0xff] }
   0x4   :  { %140 = vmatprep.subr.bf16.mxu0 %v147_v1  ;;  %v111_v9 = vld [vmem:[%s223_s3] sm:$0xff] }
   0x7   :  { %141 = vmatpush3.bf16.msra.mxu0 %v147_v1 }
   0xa   :  { %143 = vmatmul.mubr.msk.bf16.vlgmr.msra.gmra.mrb[0].mxu0 %vm55_vm0, %v149_v3 }
  0xdd   :  { %v144_v5 = vpop.f32.mrb[0].mxu0 }
  0xde   :  { %v105_v7 = vadd.f32 %v144_v5, %v127_v4  ;;  %v96_v8 = vpop.f32.mrb[1].mxu0 }
  0xdf   :  { %v97_v10 = vadd.f32 %v127_v4, %v96_v8  ;;  %v145_v11 = vpop.f32.mrb[2].mxu0 }
  0xe0   :  { %v117_v13 = vadd.f32 %v113_v6, %v105_v7  ;;  %v108_v14 = vadd.f32 %v145_v11, %v127_v4  ;;  %v99_v15 = vpop.f32.mrb[3].mxu0 }
  0xe1   :  { %v115_v17 = vadd.f32 %v111_v9, %v97_v10  ;;  %v100_v18 = vadd.f32 %v127_v4, %v99_v15 }
  0xe2   :  { %121 = vst.msk [vmem:[%s224_s4 + $0x10] sm:$0xff] %vm55_vm0, %v117_v13  ;;  %v118_v19 = vadd.f32 %v114_v12, %v108_v14 }
  0xe3   :  { %119 = vst.msk [vmem:[%s224_s4] sm:$0xff] %vm55_vm0, %v115_v17  ;;  %v116_v20 = vadd.f32 %v112_v16, %v100_v18 }
  0xe4   :  { %122 = vst.msk [vmem:[%s224_s4 + $0x18] sm:$0xff] %vm55_vm0, %v118_v19 }
  0xe5   :  { %120 = vst.msk [vmem:[%s224_s4 + $0x8] sm:$0xff] %vm55_vm0, %v116_v20 }

// kernel: reformer_encoder_layer.7
= control target key start
LH: loop header
LB: loop body
LE: loop exit
PB: predicated region body
PF: predicated region fallthrough
CT: control target
= control target key end

     0   :  { %vm36_vm0 = vcmask 261120   ;;  %s581_s0 = inlined_call_operand.vmem [shape: f32[32,32], index: 0, kind: input, shape index: {}]   ;;  %s582_s1 = inlined_call_operand.vmem [shape: f32[1,32], index: 1, kind: input, shape index: {}]   ;;  %s583_s2 = inlined_call_operand.vmem [shape: f32[1,32], index: 2, kind: input, shape index: {}]   ;;  %s584_s3 = inlined_call_operand.vmem [shape: bf16[32,64], index: 3, kind: input, shape index: {}]   ;;  %s585_s4 = inlined_call_operand.vmem [shape: f32[1,64], index: 4, kind: input, shape index: {}]   ;;  %s586_s5 = inlined_call_operand.vmem [shape: bf16[64,32], index: 5, kind: input, shape index: {}]   ;;  %s587_s6 = inlined_call_operand.vmem [shape: f32[1,32], index: 6, kind: input, shape index: {}]   ;;  %s588_s7 = inlined_call_operand.hbm [shape: f32[32,32], index: 7, kind: output, shape index: {}]  }
   0x1   :  { %v486_v0 = vld [vmem:[%s581_s0] sm:$0xff]  ;;  %v491_v1 = vld [vmem:[%s581_s0 + $0x10] sm:$0xff]  ;;  %v496_v2 = vld [vmem:[%s581_s0 + $0x8] sm:$0xff] }
   0x2   :  { %v37_v3 = vsel %vm36_vm0, %v486_v0, 0.0  ;;  %v43_v4 = vsel %vm36_vm0, %v491_v1, 0.0  ;;  %v505_v5 = vld [vmem:[%s581_s0 + $0x18] sm:$0xff]  ;;  %v40_v6 = vsel %vm36_vm0, %v496_v2, 0.0 }
   0x3   :  { %38 = vadd.xlane.f32.xlu0 %v37_v3  ;;  %44 = vadd.xlane.f32.xlu1 %v43_v4  ;;  %v46_v7 = vsel %vm36_vm0, %v505_v5, 0.0 }
   0x7   :  { %41 = vadd.xlane.f32.xlu0 %v40_v6  ;;  %47 = vadd.xlane.f32.xlu1 %v46_v7 }
   0x8   :  { %12 = vsyncpa [#allocation5], 0  ;;  %v401_v28 = vld [vmem:[%s584_s3] sm:$0xff]   ;;  %v402_v29 = vld [vmem:[%s584_s3 + $0x8] sm:$0xff]   ;;  %vm243_vm1 = vcmask 523264   ;;  %s440_s23 = smov [#allocation4]  }
   0x9   :  { %377 = vmatprep.subr.bf16.mxu0 %v401_v28  ;;  %v403_v30 = vld [vmem:[%s586_s5] sm:$0xff]   ;;  %v404_v31 = vld [vmem:[%s586_s5 + $0x8] sm:$0xff]   ;;  %v405_v6 = vld [vmem:[%s586_s5 + $0x10] sm:$0xff]   ;;  %s342_s24 = sshll.u32 %s440_s23, 4  ;;  %s343_s24 = int_to_ptr.vmem [resolvable:$true] %s342_s24 }
   0xa   :  { %378 = vmatpush3.bf16.msra.mxu0 %v401_v28  ;;  %385 = vmatprep.subr.bf16.mxu1 %v403_v30  ;;  %v353_v46 = vld [vmem:[%s582_s1] ss:$0 sm:$0xff]  ;;  %v406_v7 = vld [vmem:[%s586_s5 + $0x18] sm:$0xff]   ;;  %p420_p1 = scmp.lt.s32.totalorder %s343_s24, %s343_s24 }
   0xb   :  { %379 = vmatprep.subr.bf16.mxu0 %v402_v29  ;;  %386 = vmatpush3.bf16.msra.mxu1 %v403_v30  ;;  %v354_v51 = vld [vmem:[%s583_s2] ss:$0 sm:$0xff] }
   0xc   :  { %387 = vmatprep.subr.bf16.mxu1 %v404_v31 }
   0xe   :  { %380 = vmatpush3.bf16.msra.mxu0 %v402_v29 }
   0xf   :  { %388 = vmatpush3.bf16.msra.mxu1 %v404_v31 }
  0x10   :  { %389 = vmatprep.subr.bf16.mxu1 %v405_v6 }
  0x13   :  { %390 = vmatpush3.bf16.msra.mxu1 %v405_v6 }
  0x14   :  { %391 = vmatprep.subr.bf16.mxu1 %v406_v7 }
  0x17   :  { %392 = vmatpush3.bf16.msra.mxu1 %v406_v7 }
  0x90   :  { %v39_v8 = vpop.xlane.xlu0 %38  ;;  %v45_v9 = vpop.xlane.xlu1 %44 }
  0x91   :  { %v50_v10 = vmul.f32 0.03125, %v39_v8  ;;  %v52_v11 = vmul.f32 0.03125, %v45_v9  ;;  %v439_v8 = vmov 0.0   ;;  %v355_v9 = vld [vmem:[%s585_s4] ss:$0 sm:$0xff] }
  0x92   :  { %118 = vst.msk [vmem:[#allocation3 + $0x10] sm:$0xff] %vm36_vm0, %v439_v8  ;;  %116 = vst.msk [vmem:[#allocation3] sm:$0xff] %vm36_vm0, %v439_v8 }
  0x93   :  { %v54_v12 = vsub.f32 %v486_v0, %v50_v10  ;;  %v56_v13 = vsub.f32 %v491_v1, %v52_v11  ;;  %117 = vst.msk [vmem:[#allocation3 + $0x8] sm:$0xff] %vm36_vm0, %v439_v8  ;;  %119 = vst.msk [vmem:[#allocation3 + $0x18] sm:$0xff] %vm36_vm0, %v439_v8 }
  0x94   :  { %v42_v14 = vpop.xlane.xlu0 %41  ;;  %v48_v15 = vpop.xlane.xlu1 %47 }
  0x95   :  { %v51_v16 = vmul.f32 0.03125, %v42_v14  ;;  %v53_v17 = vmul.f32 0.03125, %v48_v15  ;;  %v58_v18 = vmul.f32 %v54_v12, %v54_v12  ;;  %v60_v19 = vmul.f32 %v56_v13, %v56_v13 }
  0x97   :  { %v55_v20 = vsub.f32 %v496_v2, %v51_v16  ;;  %v57_v21 = vsub.f32 %v505_v5, %v53_v17  ;;  %v62_v22 = vsel %vm36_vm0, %v58_v18, 0.0  ;;  %v68_v23 = vsel %vm36_vm0, %v60_v19, 0.0 }
  0x98   :  { %63 = vadd.xlane.f32.xlu0 %v62_v22 }
  0x99   :  { %v59_v24 = vmul.f32 %v55_v20, %v55_v20  ;;  %v61_v25 = vmul.f32 %v57_v21, %v57_v21 }
  0x9a   :  { %v208_v30 = vld [vmem:[#allocation3 + $0x8] sm:$0xff] }
  0x9b   :  { %v65_v26 = vsel %vm36_vm0, %v59_v24, 0.0  ;;  %v71_v27 = vsel %vm36_vm0, %v61_v25, 0.0  ;;  %v209_v24 = vld [vmem:[#allocation3 + $0x10] sm:$0xff]  ;;  %v207_v25 = vld [vmem:[#allocation3] sm:$0xff] }
  0x9c   :  { %69 = vadd.xlane.f32.xlu0 %v68_v23  ;;  %66 = vadd.xlane.f32.xlu1 %v65_v26 }
  0xa0   :  { %72 = vadd.xlane.f32.xlu1 %v71_v27  ;;  %v210_v27 = vld [vmem:[#allocation3 + $0x18] sm:$0xff] }
 0x125   :  { %v64_v32 = vpop.xlane.xlu0 %63 }
 0x126   :  { %v74_v33 = vmul.f32 0.03125, %v64_v32 }
 0x128   :  { %v78_v34 = vadd.f32 1e-05, %v74_v33 }
 0x129   :  { %v67_v35 = vpop.xlane.xlu1 %66  ;;  %v70_v36 = vpop.xlane.xlu0 %69 }
 0x12a   :  { %407 = vrsqrt.f32 %v78_v34  ;;  %v75_v37 = vmul.f32 0.03125, %v67_v35  ;;  %v76_v38 = vmul.f32 0.03125, %v70_v36  ;;  %v366_v36 = vld [vmem:[%s587_s6] ss:$0 sm:$0xff]  ;;  %s415_s6 = scalar_lea.vmem %s343_s24, 512 }
 0x12b   :  { %p416_p0 = scmp.ne.s32.totalorder %s343_s24, %s415_s6  ;;  %p421_p2 = scmp.lt.s32.totalorder %s415_s6, %s415_s6 }
 0x12c   :  { %v79_v39 = vadd.f32 1e-05, %v75_v37  ;;  %v80_v40 = vadd.f32 1e-05, %v76_v38 }
 0x12d   :  { %v73_v41 = vpop.xlane.xlu1 %72  ;;  %p422_p3 = por %p421_p2, %p420_p1 }
 0x12e   :  { %409 = vrsqrt.f32 %v79_v39  ;;  %v77_v42 = vmul.f32 0.03125, %v73_v41 }
 0x12f   :  { %411 = vrsqrt.f32 %v80_v40  ;;  %p423_p4 = pnand %p422_p3, %p416_p0 }
 0x130   :  { %v81_v43 = vadd.f32 1e-05, %v77_v42 }
 0x132   :  { %413 = vrsqrt.f32 %v81_v43 }
 0x134   :  { %v408_v44 = vpop.eup %407 }
 0x135   :  { %v86_v45 = vmul.f32 %v408_v44, %v54_v12 }
 0x137   :  { %v97_v49 = vmul.f32 %v353_v46, %v86_v45 }
 0x138   :  { %v410_v47 = vpop.eup %409 }
 0x139   :  { %v412_v48 = vpop.eup %411  ;;  %v87_v50 = vmul.f32 %v410_v47, %v55_v20  ;;  %v108_v55 = vadd.f32 %v354_v51, %v97_v49 }
 0x13a   :  { %v88_v52 = vmul.f32 %v412_v48, %v56_v13 }
 0x13b   :  { %v98_v53 = vmul.f32 %v353_v46, %v87_v50 }
 0x13c   :  { %v414_v54 = vpop.eup %413  ;;  %v99_v57 = vmul.f32 %v353_v46, %v88_v52 }
 0x13d   :  { %v109_v56 = vadd.f32 %v354_v51, %v98_v53  ;;  %v89_v58 = vmul.f32 %v414_v54, %v57_v21 }
 0x13e   :  { %v110_v61 = vadd.f32 %v354_v51, %v99_v57 }
 0x13f   :  { %v112_v59 = vpack.c.bf16 %v109_v56, %v108_v55  ;;  %v100_v60 = vmul.f32 %v353_v46, %v89_v58 }
 0x141   :  { %114 = vst.msk [vmem:[#allocation2] sm:$0xff] %vm36_vm0, %v112_v59  ;;  %v111_v62 = vadd.f32 %v354_v51, %v100_v60 }
 0x143   :  { %v113_v63 = vpack.c.bf16 %v111_v62, %v110_v61 }
 0x145   :  { %115 = vst.msk [vmem:[#allocation2 + $0x8] sm:$0xff] %vm36_vm0, %v113_v63 }
 0x148   :  { %v120_v3 = vld [vmem:[#allocation2] sm:$0xff] }
 0x149   :  { %381 = vmatprep.mubr.msk.bf16.mxu0 %vm36_vm0, %v120_v3 }
 0x14c   :  { %v121_v4 = vld [vmem:[#allocation2 + $0x8] sm:$0xff] }
 0x14d   :  { %382 = vmatmul.mubr.msk.bf16.vlgmr.msra.gmra.mrb[0].mxu0 %vm36_vm0, %v121_v4 }
 0x220   :  { %v383_v10 = vpop.f32.mrb[0].mxu0 }
 0x221   :  { %v195_v11 = vadd.f32 %v383_v10, %v355_v9  ;;  %v186_v12 = vpop.f32.mrb[1].mxu0 }
 0x222   :  { %v187_v13 = vadd.f32 %v355_v9, %v186_v12  ;;  %v384_v14 = vpop.f32.mrb[2].mxu0 }
 0x223   :  { %v198_v15 = vadd.f32 %v384_v14, %v355_v9  ;;  %v189_v16 = vpop.f32.mrb[3].mxu0  ;;  %v203_v18 = vmax.f32 %v195_v11, 0.0 }
 0x224   :  { %v190_v17 = vadd.f32 %v355_v9, %v189_v16  ;;  %v201_v20 = vmax.f32 %v187_v13, 0.0 }
 0x225   :  { %v204_v19 = vmax.f32 %v198_v15, 0.0 }
 0x226   :  { %v202_v21 = vmax.f32 %v190_v17, 0.0 }
 0x227   :  { %v206_v22 = vpack.c.bf16 %v204_v19, %v203_v18 }
 0x228   :  { %v205_v23 = vpack.c.bf16 %v202_v21, %v201_v20 }
 0x22a   :  { %393 = vmatprep.mubr.msk.bf16.mxu1 %vm243_vm1, %v205_v23 }
 0x22b   :  { %394 = vmatmul.mubr.msk.bf16.vlgmr.msra.gmra.mrb[0].mxu1 %vm243_vm1, %v206_v22 }
 0x2fe   :  { %v395_v26 = vpop.f32.mrb[0].mxu1 }
 0x2ff   :  { %v301_v28 = vadd.f32 %v395_v26, %v209_v24  ;;  %v284_v29 = vpop.f32.mrb[1].mxu1 }
 0x300   :  { %v299_v31 = vadd.f32 %v284_v29, %v207_v25  ;;  %v396_v32 = vpop.f32.mrb[2].mxu1 }
 0x301   :  { %305 = vst.msk [vmem:[#allocation3 + $0x10] sm:$0xff] %vm36_vm0, %v301_v28  ;;  %v302_v33 = vadd.f32 %v396_v32, %v210_v27  ;;  %v287_v34 = vpop.f32.mrb[3].mxu1 }
 0x302   :  { %303 = vst.msk [vmem:[#allocation3] sm:$0xff] %vm36_vm0, %v299_v31  ;;  %v300_v35 = vadd.f32 %v287_v34, %v208_v30 }
 0x303   :  { %306 = vst.msk [vmem:[#allocation3 + $0x18] sm:$0xff] %vm36_vm0, %v302_v33 }
 0x304   :  { %304 = vst.msk [vmem:[#allocation3 + $0x8] sm:$0xff] %vm36_vm0, %v300_v35 }
 0x308   :  { %v312_v37 = vld [vmem:[#allocation3 + $0x10] sm:$0xff] }
 0x309   :  { %v310_v38 = vld [vmem:[#allocation3] sm:$0xff]  ;;  %v323_v39 = vadd.f32 %v366_v36, %v312_v37 }
 0x30a   :  { %v313_v40 = vld [vmem:[#allocation3 + $0x18] sm:$0xff]  ;;  %v321_v41 = vadd.f32 %v366_v36, %v310_v38 }
 0x30b   :  { %v311_v42 = vld [vmem:[#allocation3 + $0x8] sm:$0xff]  ;;  %v324_v43 = vadd.f32 %v366_v36, %v313_v40  ;;  %v331_v44 = vadd.f32 %v323_v39, %v491_v1 }
 0x30c   :  { %v322_v45 = vadd.f32 %v366_v36, %v311_v42  ;;  %v329_v46 = vadd.f32 %v321_v41, %v486_v0 }
 0x30d   :  { %v332_v47 = vadd.f32 %v324_v43, %v505_v5  ;;  %335 = vst.msk [vmem:[#allocation4 + $0x10] sm:$0xff] %vm36_vm0, %v331_v44 }
 0x30e   :  { %v330_v48 = vadd.f32 %v322_v45, %v496_v2  ;;  %333 = vst.msk [vmem:[#allocation4] sm:$0xff] %vm36_vm0, %v329_v46 }
 0x30f   :  { %336 = vst.msk [vmem:[#allocation4 + $0x18] sm:$0xff] %vm36_vm0, %v332_v47 }
 0x310   :  { %334 = vst.msk [vmem:[#allocation4 + $0x8] sm:$0xff] %vm36_vm0, %v330_v48 }
 0x311   :  { %426 = shalt.err (!%p423_p4)
}
 0x312   :  { %s427_s27 = scalar_lea.hbm %s588_s7, 512 }
 0x313   :  { %p428_p5 = scmp.ne.s32.totalorder %s588_s7, %s427_s27  ;;  %p431_p6 = scmp.lt.u32.totalorder %s427_s27, %s588_s7 }
 0x315   :  { %p433_p7 = pnand %p431_p6, %p428_p5 }
 0x317   :  { %436 = shalt.err (!%p433_p7)
}
 0x318   :  { %s441_s0 = smov 128   ;;  %s442_s9 = smov 8  }
 0x319   :  { %348 = dma.vmem_to_hbm [thread:$0]  %s343_s24, 512, %s588_s7, [#allocation5], %s441_s0, %s441_s0, %s442_s9  }
 0x31a   :  { %437 = dma.done.wait [#allocation5], 512  }
 0x31b   :  { %438 = vsyncadd [#allocation5], 4294966784 }
 0x31c   :  { %352 = vsyncpa [#allocation5], 1 }

</bundles_post_ra>
